<compile_context>
chip_gen: v5e
topology: v5e:2x2
jax: 0.10.0
libtpu: 0.0.40
codegen_flags: <defaults>
</compile_context>

<pallas_src>
import functools

import jax
import jax.numpy as jnp
from jax.experimental import pallas as pl
from jax.experimental.pallas import tpu as pltpu

H1, H2, H_OUT = 512, 256, 1
NEG_SLOPE = 0.2

# Small synthetic image shape for the self-test (the real module uses
# (200, 32, 32) => K = 204800; hidden widths 512/256/1 are kept exactly).
IMG_SHAPE = (4, 16, 16)


# ----------------------------------------------------------------------------
# Generation-aware defaults: (bm_cap, tk_target, vmem_limit_bytes)
# ----------------------------------------------------------------------------
_GEN_DEFAULTS = {
    # v5e: at B>=256 layer 1 is MXU-bound -> keep bm at 256, spend VMEM on tk.
    "v5": (256, 4096, 64 * 1024 * 1024),
    # v6e: HBM-bound on W1 -> big batch block (fewer W1 re-streams), tk=8192.
    "v6": (512, 8192, 100 * 1024 * 1024),
    # v7x: only 64 MiB VMEM/TC -> cap the resident working set well below it.
    "v7": (512, 4096, 48 * 1024 * 1024),
    # Unknown chip: conservative tiles, leave the scoped-VMEM default alone.
    "other": (256, 2048, None),
}


def _tpu_generation():
    try:
        kind = jax.devices()[0].device_kind.lower()
    except Exception:
        return "other"
    if "v5" in kind:
        return "v5"
    if "v6" in kind or "trillium" in kind:
        return "v6"
    if "v7" in kind or "7x" in kind:
        return "v7"
    return "other"


def _supports_buffered():
    if not hasattr(pl, "Buffered"):
        return False
    try:
        pl.BlockSpec((8, 128), lambda i: (0, 0), pipeline_mode=pl.Buffered(1))
        return True
    except Exception:
        return False


_HAS_BUFFERED = _supports_buffered()


def _const_spec(shape):
    """BlockSpec for an operand whose block index never changes.

    Single-buffered when the installed Pallas supports pipeline_mode: the
    block is fetched once and double-buffering it would only waste VMEM.
    """
    index_map = lambda *_: (0,) * len(shape)
    if _HAS_BUFFERED:
        return pl.BlockSpec(shape, index_map, pipeline_mode=pl.Buffered(1))
    return pl.BlockSpec(shape, index_map)


# ----------------------------------------------------------------------------
# Kernels
# ----------------------------------------------------------------------------
def _leaky_relu(x, slope):
    return jnp.where(x > 0, x, slope * x)


def _tail_layers(h1_pre, b1, w2, b2, w3_row, b3):
    """Layers 2 and 3 given the f32 pre-activation of layer 1."""
    h1 = _leaky_relu(h1_pre + b1, NEG_SLOPE)
    h2 = jnp.dot(h1, w2, preferred_element_type=jnp.float32) + b2
    h2 = _leaky_relu(h2, NEG_SLOPE)
    # (B,256)@(256,1) would waste a full MXU pass at N=1; do it on the
    # VPU/XLU instead: elementwise multiply with the (1,256) row + lane sum.
    return jnp.sum(h2 * w3_row, axis=-1, keepdims=True) + b3


def _disc_kernel_fused(x_ref, w1_ref, b1_ref, w2_ref, b2_ref, w3_ref, b3_ref,
                       out_ref):
    # Whole K in one shot.  x arrives f32; cast the VMEM tile to bf16 right
    # before the dot so the VPU cast overlaps the MXU (no wrapper-side
    # convert / extra HBM traffic).
    x_bf = x_ref[...].astype(jnp.bfloat16)
    h1_pre = jnp.dot(x_bf, w1_ref[...], preferred_element_type=jnp.float32)
    out = _tail_layers(h1_pre, b1_ref[...], w2_ref[...], b2_ref[...],
                       w3_ref[...], b3_ref[...])
    out_ref[...] = out.astype(out_ref.dtype)


def _disc_kernel_tiled(x_ref, w1_ref, b1_ref, w2_ref, b2_ref, w3_ref, b3_ref,
                       out_ref, acc_ref):
    k = pl.program_id(1)

    @pl.when(k == 0)
    def _():
        acc_ref[...] = jnp.zeros_like(acc_ref)

    # Layer-1 partial product: (bm, tk) @ (tk, 512), f32 accumulation.
    x_bf = x_ref[...].astype(jnp.bfloat16)
    acc_ref[...] += jnp.dot(x_bf, w1_ref[...],
                            preferred_element_type=jnp.float32)

    @pl.when(k == pl.num_programs(1) - 1)
    def _():
        out = _tail_layers(acc_ref[...], b1_ref[...], w2_ref[...], b2_ref[...],
                           w3_ref[...], b3_ref[...])
        out_ref[...] = out.astype(out_ref.dtype)


# ----------------------------------------------------------------------------
# Wrapper
# ----------------------------------------------------------------------------
@functools.partial(jax.jit, static_argnames=("tk", "bm"))
def discriminator_forward(img, params, *, tk=None, bm=None):
    """img: (B, C, H, W) float32. Returns validity scores (B, 1) float32."""
    w1, b1, w2, b2, w3, b3 = params
    B = img.shape[0]

    # Flatten; keep x in f32 (cast to bf16 happens per-tile inside the kernel).
    x = img.reshape(B, -1)
    K = x.shape[1]

    # W1 dominates the HBM stream: carry it as bf16 (f32 accumulation keeps
    # accuracy).  In a real training loop the weight should be stored bf16
    # once rather than converted per call.
    w1 = w1.astype(jnp.bfloat16)
    b1 = b1.reshape(1, H1).astype(jnp.float32)
    w2 = w2.astype(jnp.float32)
    b2 = b2.reshape(1, H2).astype(jnp.float32)
    w3_row = w3.reshape(1, H2).astype(jnp.float32)       # (256, 1) -> (1, 256)
    b3 = b3.reshape(1, H_OUT).astype(jnp.float32)

    gen = _tpu_generation()
    bm_cap, tk_target, vmem_limit = _GEN_DEFAULTS[gen]

    # ---- batch tiling: as big as VMEM allows so W1 is re-streamed at most
    # n_b = B_pad/bm times (its index_map ignores the batch axis).
    if bm is None:
        bm = bm_cap if B >= bm_cap else max(16, ((B + 15) // 16) * 16)
    B_pad = ((B + bm - 1) // bm) * bm
    if B_pad != B:
        x = jnp.pad(x, ((0, B_pad - B), (0, 0)))
    n_b = B_pad // bm

    # ---- K tiling: fused single pass when K fits the per-generation target,
    # otherwise K-tiled accumulation.  Ragged K is zero-padded (zeros add
    # nothing to the dot).
    if tk is None:
        tk = K if K <= tk_target else tk_target
    tk = min(tk, K)
    K_pad = K
    if tk < K:
        tk = max(128, (tk // 128) * 128)          # lane alignment for x chunks
        K_pad = ((K + tk - 1) // tk) * tk
        if K_pad != K:
            x = jnp.pad(x, ((0, 0), (0, K_pad - K)))
            w1 = jnp.pad(w1, ((0, K_pad - K), (0, 0)))
    n_k = K_pad // tk

    # ---- advisory cost estimate (W1 is streamed once per batch block in the
    # tiled path; x is read as f32).
    w1_streams = 1 if n_k == 1 else n_b
    flops = 2.0 * B_pad * (K_pad * H1 + H1 * H2 + H2)
    bytes_accessed = (B_pad * K_pad * 4                     # x (f32)
                      + w1_streams * K_pad * H1 * 2         # W1 (bf16), n_b reads
                      + (H1 + H1 * H2 + 2 * H2 + H_OUT) * 4  # tail constants
                      + B_pad * H_OUT * 4)                  # output
    cost = pl.CostEstimate(flops=int(flops), transcendentals=0,
                           bytes_accessed=int(bytes_accessed))

    out_shape = jax.ShapeDtypeStruct((B_pad, H_OUT), jnp.float32)
    tail_specs = [
        _const_spec((1, H1)),        # b1
        _const_spec((H1, H2)),       # W2
        _const_spec((1, H2)),        # b2
        _const_spec((1, H2)),        # w3 row
        _const_spec((1, H_OUT)),     # b3
    ]

    if n_k == 1:
        # Fused single-pass kernel: no scratch, no pl.when gating.  W1's block
        # index is constant, so it is single-buffered too.
        out = pl.pallas_call(
            _disc_kernel_fused,
            out_shape=out_shape,
            grid_spec=pltpu.PrefetchScalarGridSpec(
                num_scalar_prefetch=0,
                grid=(n_b,),
                in_specs=[pl.BlockSpec((bm, K_pad), lambda b: (b, 0)),  # x
                          _const_spec((K_pad, H1)),                    # W1
                          *tail_specs],
                out_specs=pl.BlockSpec((bm, H_OUT), lambda b: (b, 0)),
            ),
            compiler_params=pltpu.CompilerParams(
                dimension_semantics=("parallel",),
                vmem_limit_bytes=vmem_limit),
            cost_estimate=cost,
        )(x, w1, b1, w2, b2, w3_row, b3)
    else:
        # K-tiled accumulation kernel (reduction axis last in the grid).
        out = pl.pallas_call(
            _disc_kernel_tiled,
            out_shape=out_shape,
            grid_spec=pltpu.PrefetchScalarGridSpec(
                num_scalar_prefetch=0,
                grid=(n_b, n_k),
                in_specs=[pl.BlockSpec((bm, tk), lambda b, k: (b, k)),   # x
                          pl.BlockSpec((tk, H1), lambda b, k: (k, 0)),   # W1
                          *tail_specs],
                out_specs=pl.BlockSpec((bm, H_OUT), lambda b, k: (b, 0)),
                scratch_shapes=[pltpu.VMEM((bm, H1), jnp.float32)],
            ),
            compiler_params=pltpu.CompilerParams(
                dimension_semantics=("parallel", "arbitrary"),
                vmem_limit_bytes=vmem_limit),
            cost_estimate=cost,
        )(x, w1, b1, w2, b2, w3_row, b3)

    return out[:B]


# ----------------------------------------------------------------------------
# Params / reference / self-test
# ----------------------------------------------------------------------------
def init_params(key, in_features):
    """PyTorch nn.Linear-style init: U(-1/sqrt(fan_in), 1/sqrt(fan_in)).
    Weights stored as (in_features, out_features)."""
    dims = [(in_features, H1), (H1, H2), (H2, H_OUT)]
    params = []
    for fan_in, fan_out in dims:
        key, kw, kb = jax.random.split(key, 3)
        bound = 1.0 / float(fan_in) ** 0.5
        w = jax.random.uniform(kw, (fan_in, fan_out), jnp.float32,
                               minval=-bound, maxval=bound)
        b = jax.random.uniform(kb, (1, fan_out), jnp.float32,
                               minval=-bound, maxval=bound)
        params += [w, b]
    return tuple(params)


def _reference_forward(img, params):
    w1, b1, w2, b2, w3, b3 = params
    x = img.reshape(img.shape[0], -1).astype(jnp.float32)
    h = _leaky_relu(x @ w1 + b1, NEG_SLOPE)
    h = _leaky_relu(h @ w2 + b2, NEG_SLOPE)
    return h @ w3 + b3


if __name__ == "__main__":
    key = jax.random.PRNGKey(0)
    k_img, k_par, k_img2, k_par2 = jax.random.split(key, 4)

    # --- primary test: fused single-step path (K = 4*16*16 = 1024) ---
    batch = 2
    img = jax.random.normal(k_img, (batch,) + IMG_SHAPE, dtype=jnp.float32)
    in_features = IMG_SHAPE[0] * IMG_SHAPE[1] * IMG_SHAPE[2]
    params = init_params(k_par, in_features)

    out = jax.block_until_ready(discriminator_forward(img, params))
    ref = _reference_forward(img, params)
    assert out.shape == (batch, H_OUT), out.shape
    # bf16 x/W1 with f32 accumulation -> relaxed tolerance vs the f32 reference.
    assert jnp.allclose(out, ref, atol=2e-2, rtol=2e-2), (out, ref)

    # --- secondary test: K-tiled accumulation path (K = 4096, tk = 2048) ---
    batch2, shape2 = 4, (16, 16, 16)
    img2 = jax.random.normal(k_img2, (batch2,) + shape2, dtype=jnp.float32)
    params2 = init_params(k_par2, shape2[0] * shape2[1] * shape2[2])
    out2 = jax.block_until_ready(
        discriminator_forward(img2, params2, tk=2048))
    ref2 = _reference_forward(img2, params2)
    assert out2.shape == (batch2, H_OUT), out2.shape
    assert jnp.allclose(out2, ref2, atol=2e-2, rtol=2e-2), (out2, ref2)

    print("KERNEL_OK")
</pallas_src>

<mosaic_0001>
module attributes {stable_mosaic.version = 11 : i64} {
  func.func @_disc_kernel_fused(%arg0: i32, %arg1: memref<16x1024xf32, #tpu.memory_space<vmem>>, %arg2: memref<1024x512xbf16, #tpu.memory_space<vmem>>, %arg3: memref<1x512xf32, #tpu.memory_space<vmem>>, %arg4: memref<512x256xf32, #tpu.memory_space<vmem>>, %arg5: memref<1x256xf32, #tpu.memory_space<vmem>>, %arg6: memref<1x256xf32, #tpu.memory_space<vmem>>, %arg7: memref<1x1xf32, #tpu.memory_space<vmem>>, %arg8: memref<16x1xf32, #tpu.memory_space<vmem>>) attributes {dimension_semantics = [#tpu.dimension_semantics<parallel>], iteration_bounds = array<i64: 1>, scalar_prefetch = 0 : i64, scratch_operands = 0 : i64, tpu.core_type = #tpu.core_type<tc>, window_params = [{transform_indices = @transform_0, window_bounds = array<i64: 16, 1024>}, {pipeline_mode = #tpu.pipeline_mode<synchronous>, transform_indices = @transform_1, window_bounds = array<i64: 1024, 512>}, {pipeline_mode = #tpu.pipeline_mode<synchronous>, transform_indices = @transform_2, window_bounds = array<i64: 1, 512>}, {pipeline_mode = #tpu.pipeline_mode<synchronous>, transform_indices = @transform_3, window_bounds = array<i64: 512, 256>}, {pipeline_mode = #tpu.pipeline_mode<synchronous>, transform_indices = @transform_4, window_bounds = array<i64: 1, 256>}, {pipeline_mode = #tpu.pipeline_mode<synchronous>, transform_indices = @transform_5, window_bounds = array<i64: 1, 256>}, {pipeline_mode = #tpu.pipeline_mode<synchronous>, transform_indices = @transform_6, window_bounds = array<i64: 1, 1>}, {transform_indices = @transform_7, window_bounds = array<i64: 16, 1>}]} {
    %c0 = arith.constant 0 : index
    %c0_0 = arith.constant 0 : index
    %0 = vector.load %arg1[%c0, %c0_0] : memref<16x1024xf32, #tpu.memory_space<vmem>>, vector<16x1024xf32>
    %1 = arith.truncf %0 : vector<16x1024xf32> to vector<16x1024xbf16>
    %c0_1 = arith.constant 0 : index
    %c0_2 = arith.constant 0 : index
    %2 = vector.load %arg2[%c0_1, %c0_2] : memref<1024x512xbf16, #tpu.memory_space<vmem>>, vector<1024x512xbf16>
    %cst = arith.constant dense<0.000000e+00> : vector<16x512xf32>
    %3 = tpu.matmul %1, %2, %cst {dimension_numbers = #tpu.dot_dimension_numbers<[1], [0], [0], [1], [0, 0, 1, 1], [], []>} : vector<16x1024xbf16>, vector<1024x512xbf16>, vector<16x512xf32> -> vector<16x512xf32>
    %c0_3 = arith.constant 0 : index
    %c0_4 = arith.constant 0 : index
    %4 = vector.load %arg3[%c0_3, %c0_4] : memref<1x512xf32, #tpu.memory_space<vmem>>, vector<1x512xf32>
    %c0_5 = arith.constant 0 : index
    %c0_6 = arith.constant 0 : index
    %5 = vector.load %arg4[%c0_5, %c0_6] : memref<512x256xf32, #tpu.memory_space<vmem>>, vector<512x256xf32>
    %c0_7 = arith.constant 0 : index
    %c0_8 = arith.constant 0 : index
    %6 = vector.load %arg5[%c0_7, %c0_8] : memref<1x256xf32, #tpu.memory_space<vmem>>, vector<1x256xf32>
    %c0_9 = arith.constant 0 : index
    %c0_10 = arith.constant 0 : index
    %7 = vector.load %arg6[%c0_9, %c0_10] : memref<1x256xf32, #tpu.memory_space<vmem>>, vector<1x256xf32>
    %c0_11 = arith.constant 0 : index
    %c0_12 = arith.constant 0 : index
    %8 = vector.load %arg7[%c0_11, %c0_12] : memref<1x1xf32, #tpu.memory_space<vmem>>, vector<1x1xf32>
    %9 = vector.broadcast %4 : vector<1x512xf32> to vector<16x512xf32>
    %10 = arith.addf %3, %9 : vector<16x512xf32>
    %cst_13 = arith.constant 0.000000e+00 : f32
    %11 = vector.broadcast %cst_13 : f32 to vector<16x512xf32>
    %12 = arith.cmpf ogt, %10, %11 : vector<16x512xf32>
    %cst_14 = arith.constant 2.000000e-01 : f32
    %13 = vector.broadcast %cst_14 : f32 to vector<16x512xf32>
    %14 = arith.mulf %13, %10 : vector<16x512xf32>
    %15 = arith.select %12, %10, %14 : vector<16x512xi1>, vector<16x512xf32>
    %cst_15 = arith.constant dense<0.000000e+00> : vector<16x256xf32>
    %16 = tpu.matmul %15, %5, %cst_15 {dimension_numbers = #tpu.dot_dimension_numbers<[1], [0], [0], [1], [0, 0, 1, 1], [], []>} : vector<16x512xf32>, vector<512x256xf32>, vector<16x256xf32> -> vector<16x256xf32>
    %17 = vector.broadcast %6 : vector<1x256xf32> to vector<16x256xf32>
    %18 = arith.addf %16, %17 : vector<16x256xf32>
    %cst_16 = arith.constant 0.000000e+00 : f32
    %19 = vector.broadcast %cst_16 : f32 to vector<16x256xf32>
    %20 = arith.cmpf ogt, %18, %19 : vector<16x256xf32>
    %cst_17 = arith.constant 2.000000e-01 : f32
    %21 = vector.broadcast %cst_17 : f32 to vector<16x256xf32>
    %22 = arith.mulf %21, %18 : vector<16x256xf32>
    %23 = arith.select %20, %18, %22 : vector<16x256xi1>, vector<16x256xf32>
    %24 = vector.broadcast %7 : vector<1x256xf32> to vector<16x256xf32>
    %25 = arith.mulf %23, %24 : vector<16x256xf32>
    %cst_18 = arith.constant dense<0.000000e+00> : vector<16xf32>
    %26 = vector.multi_reduction <add>, %25, %cst_18 [1] : vector<16x256xf32> to vector<16xf32>
    %27 = vector.shape_cast %26 : vector<16xf32> to vector<16x1xf32>
    %28 = vector.broadcast %8 : vector<1x1xf32> to vector<16x1xf32>
    %29 = arith.addf %27, %28 : vector<16x1xf32>
    %c0_19 = arith.constant 0 : index
    %c0_20 = arith.constant 0 : index
    %30 = vector.load %arg8[%c0_19, %c0_20] : memref<16x1xf32, #tpu.memory_space<vmem>>, vector<16x1xf32>
    tpu.vector_store %arg8[%c0_19, %c0_20], %29 {strides = array<i32>} : memref<16x1xf32, #tpu.memory_space<vmem>>, vector<16x1xf32>,
    return
  }
  func.func @transform_0(%arg0: i32) -> (i32, i32) {
    %c0_i32 = arith.constant 0 : i32
    %c0_i32_0 = arith.constant 0 : i32
    return %arg0, %c0_i32 : i32, i32
  }
  func.func @transform_1(%arg0: i32) -> (i32, i32) {
    %c0_i32 = arith.constant 0 : i32
    %c0_i32_0 = arith.constant 0 : i32
    %c0_i32_1 = arith.constant 0 : i32
    return %c0_i32, %c0_i32_0 : i32, i32
  }
  func.func @transform_2(%arg0: i32) -> (i32, i32) {
    %c0_i32 = arith.constant 0 : i32
    %c0_i32_0 = arith.constant 0 : i32
    %c0_i32_1 = arith.constant 0 : i32
    return %c0_i32, %c0_i32_0 : i32, i32
  }
  func.func @transform_3(%arg0: i32) -> (i32, i32) {
    %c0_i32 = arith.constant 0 : i32
    %c0_i32_0 = arith.constant 0 : i32
    %c0_i32_1 = arith.constant 0 : i32
    return %c0_i32, %c0_i32_0 : i32, i32
  }
  func.func @transform_4(%arg0: i32) -> (i32, i32) {
    %c0_i32 = arith.constant 0 : i32
    %c0_i32_0 = arith.constant 0 : i32
    %c0_i32_1 = arith.constant 0 : i32
    return %c0_i32, %c0_i32_0 : i32, i32
  }
  func.func @transform_5(%arg0: i32) -> (i32, i32) {
    %c0_i32 = arith.constant 0 : i32
    %c0_i32_0 = arith.constant 0 : i32
    %c0_i32_1 = arith.constant 0 : i32
    return %c0_i32, %c0_i32_0 : i32, i32
  }
  func.func @transform_6(%arg0: i32) -> (i32, i32) {
    %c0_i32 = arith.constant 0 : i32
    %c0_i32_0 = arith.constant 0 : i32
    %c0_i32_1 = arith.constant 0 : i32
    return %c0_i32, %c0_i32_0 : i32, i32
  }
  func.func @transform_7(%arg0: i32) -> (i32, i32) {
    %c0_i32 = arith.constant 0 : i32
    %c0_i32_0 = arith.constant 0 : i32
    return %arg0, %c0_i32 : i32, i32
  }
}

</mosaic_0001>

<bundles_post_ra>
// kernel: discriminator_forward.1
= control target key start
LH: loop header
LB: loop body
LE: loop exit
PB: predicated region body
PF: predicated region fallthrough
CT: control target
= control target key end

     0   :  { %vm2422_vm12 = vcmask 7168   ;;  %s5855_s1 = inlined_call_operand.vmem [shape: bf16[1024,512], index: 1, kind: input, shape index: {}]   ;;  %s5856_s0 = inlined_call_operand.vmem [shape: f32[16,1024], index: 0, kind: input, shape index: {}]   ;;  %s5857_s2 = inlined_call_operand.vmem [shape: f32[1,512], index: 2, kind: input, shape index: {}]   ;;  %s5858_s3 = inlined_call_operand.vmem [shape: f32[512,256], index: 3, kind: input, shape index: {}]   ;;  %s5859_s4 = inlined_call_operand.vmem [shape: f32[1,256], index: 4, kind: input, shape index: {}]   ;;  %s5860_s6 = inlined_call_operand.<no memory space> [shape: f32[1,1], index: 6, kind: input, shape index: {}]   ;;  %s5861_s5 = inlined_call_operand.vmem [shape: f32[1,256], index: 5, kind: input, shape index: {}]   ;;  %s5862_s7 = inlined_call_operand.vmem [shape: f32[16,1], index: 7, kind: output, shape index: {}]  }
   0x1   :  { %v2543_v0 = vld [vmem:[%s5855_s1 + $0xe0] sm:$0xf]  ;;  %v3483_v1 = vld [vmem:[%s5855_s1 + $0xec] sm:$0xf0] }
   0x2   :  { %v2671_v2 = vld [vmem:[%s5855_s1 + $0x1e0] sm:$0xf]  ;;  %v2544_v3 = vor.u32 %v3483_v1, %v2543_v0  ;;  %v3515_v4 = vld [vmem:[%s5855_s1 + $0x1ec] sm:$0xf0] }
   0x3   :  { %v2799_v5 = vld [vmem:[%s5855_s1 + $0x2e0] sm:$0xf]  ;;  %v3547_v6 = vld [vmem:[%s5855_s1 + $0x2ec] sm:$0xf0]  ;;  %v2672_v7 = vor.u32 %v3515_v4, %v2671_v2 }
   0x4   :  { %v2800_v8 = vor.u32 %v3547_v6, %v2799_v5  ;;  %v2927_v9 = vld [vmem:[%s5855_s1 + $0x3e0] sm:$0xf]  ;;  %v3579_v10 = vld [vmem:[%s5855_s1 + $0x3ec] sm:$0xf0]  ;;  %1729 = vmatpush.bf16.msra.mxu0 %v2544_v3 }
   0x5   :  { %v2527_v11 = vld [vmem:[%s5855_s1 + $0xc0] sm:$0xf]  ;;  %v2928_v12 = vor.u32 %v3579_v10, %v2927_v9  ;;  %v3479_v13 = vld [vmem:[%s5855_s1 + $0xcc] sm:$0xf0]  ;;  %1743 = vmatpush.bf16.msra.mxu1 %v2672_v7 }
   0x6   :  { %v2655_v14 = vld [vmem:[%s5855_s1 + $0x1c0] sm:$0xf]  ;;  %v3511_v15 = vld [vmem:[%s5855_s1 + $0x1cc] sm:$0xf0]  ;;  %1757 = vmatpush.bf16.msra.mxu2 %v2800_v8  ;;  %v2528_v16 = vor.u32 %v3479_v13, %v2527_v11 }
   0x7   :  { %v2656_v17 = vor.u32 %v3511_v15, %v2655_v14  ;;  %v2783_v18 = vld [vmem:[%s5855_s1 + $0x2c0] sm:$0xf]  ;;  %v3543_v19 = vld [vmem:[%s5855_s1 + $0x2cc] sm:$0xf0]  ;;  %1771 = vmatpush.bf16.msra.mxu3 %v2928_v12 }
   0x8   :  { %v2911_v20 = vld [vmem:[%s5855_s1 + $0x3c0] sm:$0xf]  ;;  %v2784_v21 = vor.u32 %v3543_v19, %v2783_v18  ;;  %v3575_v22 = vld [vmem:[%s5855_s1 + $0x3cc] sm:$0xf0]  ;;  %1730 = vmatpush.bf16.msra.mxu0 %v2528_v16 }
   0x9   :  { %v2511_v23 = vld [vmem:[%s5855_s1 + $0xa0] sm:$0xf]  ;;  %v3475_v24 = vld [vmem:[%s5855_s1 + $0xac] sm:$0xf0]  ;;  %v2912_v25 = vor.u32 %v3575_v22, %v2911_v20  ;;  %1744 = vmatpush.bf16.msra.mxu1 %v2656_v17 }
   0xa   :  { %v2639_v26 = vld [vmem:[%s5855_s1 + $0x1a0] sm:$0xf]  ;;  %v3507_v27 = vld [vmem:[%s5855_s1 + $0x1ac] sm:$0xf0]  ;;  %v2512_v29 = vor.u32 %v3475_v24, %v2511_v23  ;;  %1758 = vmatpush.bf16.msra.mxu2 %v2784_v21 }
   0xb   :  { %v2767_v28 = vld [vmem:[%s5855_s1 + $0x2a0] sm:$0xf]  ;;  %v3539_v30 = vld [vmem:[%s5855_s1 + $0x2ac] sm:$0xf0]  ;;  %v2640_v33 = vor.u32 %v3507_v27, %v2639_v26  ;;  %1772 = vmatpush.bf16.msra.mxu3 %v2912_v25 }
   0xc   :  { %v2895_v31 = vld [vmem:[%s5855_s1 + $0x3a0] sm:$0xf]  ;;  %v3571_v32 = vld [vmem:[%s5855_s1 + $0x3ac] sm:$0xf0]  ;;  %v2768_v34 = vor.u32 %v3539_v30, %v2767_v28  ;;  %1731 = vmatpush.bf16.msra.mxu0 %v2512_v29 }
   0xd   :  { %v2495_v35 = vld [vmem:[%s5855_s1 + $0x80] sm:$0xf]  ;;  %v3471_v36 = vld [vmem:[%s5855_s1 + $0x8c] sm:$0xf0]  ;;  %v2896_v38 = vor.u32 %v3571_v32, %v2895_v31  ;;  %1745 = vmatpush.bf16.msra.mxu1 %v2640_v33 }
   0xe   :  { %v2623_v37 = vld [vmem:[%s5855_s1 + $0x180] sm:$0xf]  ;;  %v3503_v39 = vld [vmem:[%s5855_s1 + $0x18c] sm:$0xf0]  ;;  %v2496_v44 = vor.u32 %v3471_v36, %v2495_v35  ;;  %1759 = vmatpush.bf16.msra.mxu2 %v2768_v34 }
   0xf   :  { %v2751_v40 = vld [vmem:[%s5855_s1 + $0x280] sm:$0xf]  ;;  %v3535_v41 = vld [vmem:[%s5855_s1 + $0x28c] sm:$0xf0]  ;;  %v2624_v45 = vor.u32 %v3503_v39, %v2623_v37  ;;  %1773 = vmatpush.bf16.msra.mxu3 %v2896_v38 }
  0x10   :  { %v2879_v42 = vld [vmem:[%s5855_s1 + $0x380] sm:$0xf]  ;;  %v3567_v43 = vld [vmem:[%s5855_s1 + $0x38c] sm:$0xf0]  ;;  %v2752_v46 = vor.u32 %v3535_v41, %v2751_v40  ;;  %1732 = vmatpush.bf16.msra.mxu0 %v2496_v44 }
  0x11   :  { %v2479_v47 = vld [vmem:[%s5855_s1 + $0x60] sm:$0xf]  ;;  %v3467_v48 = vld [vmem:[%s5855_s1 + $0x6c] sm:$0xf0]  ;;  %v2880_v50 = vor.u32 %v3567_v43, %v2879_v42  ;;  %1746 = vmatpush.bf16.msra.mxu1 %v2624_v45 }
  0x12   :  { %v2607_v49 = vld [vmem:[%s5855_s1 + $0x160] sm:$0xf]  ;;  %v3499_v51 = vld [vmem:[%s5855_s1 + $0x16c] sm:$0xf0]  ;;  %v2480_v56 = vor.u32 %v3467_v48, %v2479_v47  ;;  %1760 = vmatpush.bf16.msra.mxu2 %v2752_v46 }
  0x13   :  { %v2735_v52 = vld [vmem:[%s5855_s1 + $0x260] sm:$0xf]  ;;  %v3531_v53 = vld [vmem:[%s5855_s1 + $0x26c] sm:$0xf0]  ;;  %v2608_v57 = vor.u32 %v3499_v51, %v2607_v49  ;;  %1774 = vmatpush.bf16.msra.mxu3 %v2880_v50 }
  0x14   :  { %v2863_v54 = vld [vmem:[%s5855_s1 + $0x360] sm:$0xf]  ;;  %v3563_v55 = vld [vmem:[%s5855_s1 + $0x36c] sm:$0xf0]  ;;  %v2736_v58 = vor.u32 %v3531_v53, %v2735_v52  ;;  %1733 = vmatpush.bf16.msra.mxu0 %v2480_v56 }
  0x15   :  { %v2463_v59 = vld [vmem:[%s5855_s1 + $0x40] sm:$0xf]  ;;  %v3463_v60 = vld [vmem:[%s5855_s1 + $0x4c] sm:$0xf0]  ;;  %v2864_v62 = vor.u32 %v3563_v55, %v2863_v54  ;;  %1747 = vmatpush.bf16.msra.mxu1 %v2608_v57 }
  0x16   :  { %v2591_v61 = vld [vmem:[%s5855_s1 + $0x140] sm:$0xf]  ;;  %v3495_v63 = vld [vmem:[%s5855_s1 + $0x14c] sm:$0xf0]  ;;  %v2464_v4 = vor.u32 %v3463_v60, %v2463_v59  ;;  %1761 = vmatpush.bf16.msra.mxu2 %v2736_v58 }
  0x17   :  { %v2719_v0 = vld [vmem:[%s5855_s1 + $0x240] sm:$0xf]  ;;  %v3527_v1 = vld [vmem:[%s5855_s1 + $0x24c] sm:$0xf0]  ;;  %v2592_v5 = vor.u32 %v3495_v63, %v2591_v61  ;;  %1775 = vmatpush.bf16.msra.mxu3 %v2864_v62 }
  0x18   :  { %v2847_v2 = vld [vmem:[%s5855_s1 + $0x340] sm:$0xf]  ;;  %v3559_v3 = vld [vmem:[%s5855_s1 + $0x34c] sm:$0xf0]  ;;  %v2720_v6 = vor.u32 %v3527_v1, %v2719_v0  ;;  %1734 = vmatpush.bf16.msra.mxu0 %v2464_v4 }
  0x19   :  { %v2447_v7 = vld [vmem:[%s5855_s1 + $0x20] sm:$0xf]  ;;  %v3459_v8 = vld [vmem:[%s5855_s1 + $0x2c] sm:$0xf0]  ;;  %v2848_v10 = vor.u32 %v3559_v3, %v2847_v2  ;;  %1748 = vmatpush.bf16.msra.mxu1 %v2592_v5 }
  0x1a   :  { %v2575_v9 = vld [vmem:[%s5855_s1 + $0x120] sm:$0xf]  ;;  %v3491_v11 = vld [vmem:[%s5855_s1 + $0x12c] sm:$0xf0]  ;;  %v2448_v16 = vor.u32 %v3459_v8, %v2447_v7  ;;  %1762 = vmatpush.bf16.msra.mxu2 %v2720_v6  ;;  %v29_v6 = vld [vmem:[%s5856_s0 + $0x8] sm:$0xff] }
  0x1b   :  { %v2703_v12 = vld [vmem:[%s5855_s1 + $0x220] sm:$0xf]  ;;  %v3523_v13 = vld [vmem:[%s5855_s1 + $0x22c] sm:$0xf0]  ;;  %v2576_v19 = vor.u32 %v3491_v11, %v2575_v9  ;;  %1776 = vmatpush.bf16.msra.mxu3 %v2848_v10  ;;  %v37_v7 = vld [vmem:[%s5856_s0 + $0x48] sm:$0xff] }
  0x1c   :  { %v2831_v14 = vld [vmem:[%s5855_s1 + $0x320] sm:$0xf]  ;;  %v3555_v15 = vld [vmem:[%s5855_s1 + $0x32c] sm:$0xf0]  ;;  %v2704_v20 = vor.u32 %v3523_v13, %v2703_v12  ;;  %1735 = vmatpush.bf16.msra.mxu0 %v2448_v16  ;;  %v31_v8 = vld [vmem:[%s5856_s0 + $0x18] sm:$0xff]  ;;  %v4041_v10 = vpack.c.bf16 %v37_v7, %v29_v6 }
  0x1d   :  { %v2431_v17 = vld [vmem:[%s5855_s1] sm:$0xf]  ;;  %v3455_v18 = vld [vmem:[%s5855_s1 + $0xc] sm:$0xf0]  ;;  %v2832_v24 = vor.u32 %v3555_v15, %v2831_v14  ;;  %1749 = vmatpush.bf16.msra.mxu1 %v2576_v19  ;;  %v39_v11 = vld [vmem:[%s5856_s0 + $0x58] sm:$0xff] }
  0x1e   :  { %v2559_v21 = vld [vmem:[%s5855_s1 + $0x100] sm:$0xf]  ;;  %v3487_v22 = vld [vmem:[%s5855_s1 + $0x10c] sm:$0xf0]  ;;  %v2432_v31 = vor.u32 %v3455_v18, %v2431_v17  ;;  %1763 = vmatpush.bf16.msra.mxu2 %v2704_v20  ;;  %v4055_v17 = vpack.c.bf16 %v39_v11, %v31_v8 }
  0x1f   :  { %v2687_v23 = vld [vmem:[%s5855_s1 + $0x200] sm:$0xf]  ;;  %v3519_v25 = vld [vmem:[%s5855_s1 + $0x20c] sm:$0xf0]  ;;  %v2560_v35 = vor.u32 %v3487_v22, %v2559_v21  ;;  %1777 = vmatpush.bf16.msra.mxu3 %v2832_v24 }
  0x20   :  { %v2815_v26 = vld [vmem:[%s5855_s1 + $0x300] sm:$0xf]  ;;  %v3551_v27 = vld [vmem:[%s5855_s1 + $0x30c] sm:$0xf0]  ;;  %v2688_v36 = vor.u32 %v3519_v25, %v2687_v23  ;;  %1736 = vmatpush.bf16.msra.mxu0 %v2432_v31 }
  0x21   :  { %v3055_v28 = vld [vmem:[%s5855_s1 + $0x4e0] sm:$0xf]  ;;  %v3611_v29 = vld [vmem:[%s5855_s1 + $0x4ec] sm:$0xf0]  ;;  %v2816_v39 = vor.u32 %v3551_v27, %v2815_v26  ;;  %1750 = vmatpush.bf16.msra.mxu1 %v2560_v35 }
  0x22   :  { %v3183_v30 = vld [vmem:[%s5855_s1 + $0x5e0] sm:$0xf]  ;;  %v3643_v32 = vld [vmem:[%s5855_s1 + $0x5ec] sm:$0xf0]  ;;  %v3056_v40 = vor.u32 %v3611_v29, %v3055_v28  ;;  %1764 = vmatpush.bf16.msra.mxu2 %v2688_v36 }
  0x23   :  { %v3311_v33 = vld [vmem:[%s5855_s1 + $0x6e0] sm:$0xf]  ;;  %v3675_v34 = vld [vmem:[%s5855_s1 + $0x6ec] sm:$0xf0]  ;;  %v3184_v43 = vor.u32 %v3643_v32, %v3183_v30  ;;  %1778 = vmatpush.bf16.msra.mxu3 %v2816_v39 }
  0x24   :  { %v3439_v37 = vld [vmem:[%s5855_s1 + $0x7e0] sm:$0xf]  ;;  %v3707_v38 = vld [vmem:[%s5855_s1 + $0x7ec] sm:$0xf0]  ;;  %v3312_v44 = vor.u32 %v3675_v34, %v3311_v33  ;;  %1785 = vmatpush.bf16.msrb.mxu0 %v3056_v40  ;;  %1751 = vmatmul.bf16.vlgmr.msra.gmra.mxu1 %v4041_v10 }
  0x25   :  { %v3039_v41 = vld [vmem:[%s5855_s1 + $0x4c0] sm:$0xf]  ;;  %v3607_v42 = vld [vmem:[%s5855_s1 + $0x4cc] sm:$0xf0]  ;;  %v3440_v48 = vor.u32 %v3707_v38, %v3439_v37  ;;  %1799 = vmatpush.bf16.msrb.mxu1 %v3184_v43 }
  0x26   :  { %v3167_v45 = vld [vmem:[%s5855_s1 + $0x5c0] sm:$0xf]  ;;  %v3639_v46 = vld [vmem:[%s5855_s1 + $0x5cc] sm:$0xf0]  ;;  %v3040_v55 = vor.u32 %v3607_v42, %v3039_v41  ;;  %1813 = vmatpush.bf16.msrb.mxu2 %v3312_v44  ;;  %1779 = vmatmul.bf16.vlgmr.msra.gmra.mxu3 %v4055_v17 }
  0x27   :  { %v3295_v47 = vld [vmem:[%s5855_s1 + $0x6c0] sm:$0xf]  ;;  %v3671_v49 = vld [vmem:[%s5855_s1 + $0x6cc] sm:$0xf0]  ;;  %v3168_v60 = vor.u32 %v3639_v46, %v3167_v45  ;;  %1827 = vmatpush.bf16.msrb.mxu3 %v3440_v48 }
  0x28   :  { %v3423_v50 = vld [vmem:[%s5855_s1 + $0x7c0] sm:$0xf]  ;;  %v3703_v51 = vld [vmem:[%s5855_s1 + $0x7cc] sm:$0xf0]  ;;  %v3296_v61 = vor.u32 %v3671_v49, %v3295_v47  ;;  %1786 = vmatpush.bf16.msrb.mxu0 %v3040_v55 }
  0x29   :  { %v28_v52 = vld [vmem:[%s5856_s0] sm:$0xff]  ;;  %v30_v54 = vld [vmem:[%s5856_s0 + $0x10] sm:$0xff]  ;;  %v3424_v2 = vor.u32 %v3703_v51, %v3423_v50  ;;  %1800 = vmatpush.bf16.msrb.mxu1 %v3168_v60 }
  0x2a   :  { %v36_v53 = vld [vmem:[%s5856_s0 + $0x40] sm:$0xff]  ;;  %v3603_v57 = vld [vmem:[%s5855_s1 + $0x4ac] sm:$0xf0]  ;;  %1814 = vmatpush.bf16.msrb.mxu2 %v3296_v61 }
  0x2b   :  { %v3023_v56 = vld [vmem:[%s5855_s1 + $0x4a0] sm:$0xf]  ;;  %v4005_v58 = vpack.c.bf16 %v36_v53, %v28_v52  ;;  %v38_v59 = vld [vmem:[%s5856_s0 + $0x50] sm:$0xff]  ;;  %1828 = vmatpush.bf16.msrb.mxu3 %v3424_v2 }
  0x2c   :  { %v3151_v62 = vld [vmem:[%s5855_s1 + $0x5a0] sm:$0xf]  ;;  %v3635_v63 = vld [vmem:[%s5855_s1 + $0x5ac] sm:$0xf0]  ;;  %v4019_v1 = vpack.c.bf16 %v38_v59, %v30_v54  ;;  %v3024_v9 = vor.u32 %v3603_v57, %v3023_v56 }
  0x2d   :  { %v3279_v0 = vld [vmem:[%s5855_s1 + $0x6a0] sm:$0xf]  ;;  %v3667_v3 = vld [vmem:[%s5855_s1 + $0x6ac] sm:$0xf0]  ;;  %1737 = vmatmul.bf16.vlgmr.msra.gmra.mxu0 %v4005_v58  ;;  %v3152_v12 = vor.u32 %v3635_v63, %v3151_v62 }
  0x2e   :  { %v3407_v4 = vld [vmem:[%s5855_s1 + $0x7a0] sm:$0xf]  ;;  %v3699_v5 = vld [vmem:[%s5855_s1 + $0x7ac] sm:$0xf0]  ;;  %1765 = vmatmul.bf16.vlgmr.msra.gmra.mxu2 %v4019_v1  ;;  %v3280_v13 = vor.u32 %v3667_v3, %v3279_v0  ;;  %1787 = vmatpush.bf16.msrb.mxu0 %v3024_v9  ;;  %v3481_v9 = vld [vmem:[%s5855_s1 + $0xe4] sm:$0xf] }
  0x2f   :  { %v3007_v14 = vld [vmem:[%s5855_s1 + $0x480] sm:$0xf]  ;;  %v3599_v15 = vld [vmem:[%s5855_s1 + $0x48c] sm:$0xf0]  ;;  %v3408_v18 = vor.u32 %v3699_v5, %v3407_v4  ;;  %1801 = vmatpush.bf16.msrb.mxu1 %v3152_v12  ;;  %v2545_v12 = vld [vmem:[%s5855_s1 + $0xf0] sm:$0xf0] }
  0x30   :  { %v3135_v16 = vld [vmem:[%s5855_s1 + $0x580] sm:$0xf]  ;;  %v3631_v19 = vld [vmem:[%s5855_s1 + $0x58c] sm:$0xf0]  ;;  %v3008_v24 = vor.u32 %v3599_v15, %v3007_v14  ;;  %1815 = vmatpush.bf16.msrb.mxu2 %v3280_v13  ;;  %v3513_v13 = vld [vmem:[%s5855_s1 + $0x1e4] sm:$0xf] }
  0x31   :  { %v3263_v20 = vld [vmem:[%s5855_s1 + $0x680] sm:$0xf]  ;;  %v3663_v21 = vld [vmem:[%s5855_s1 + $0x68c] sm:$0xf0]  ;;  %v3136_v25 = vor.u32 %v3631_v19, %v3135_v16  ;;  %1829 = vmatpush.bf16.msrb.mxu3 %v3408_v18  ;;  %v2673_v14 = vld [vmem:[%s5855_s1 + $0x1f0] sm:$0xf0] }
  0x32   :  { %v3391_v22 = vld [vmem:[%s5855_s1 + $0x780] sm:$0xf]  ;;  %v3695_v23 = vld [vmem:[%s5855_s1 + $0x78c] sm:$0xf0]  ;;  %v3264_v26 = vor.u32 %v3663_v21, %v3263_v20  ;;  %1788 = vmatpush.bf16.msrb.mxu0 %v3008_v24  ;;  %v3545_v15 = vld [vmem:[%s5855_s1 + $0x2e4] sm:$0xf] }
  0x33   :  { %v2991_v27 = vld [vmem:[%s5855_s1 + $0x460] sm:$0xf]  ;;  %v3595_v28 = vld [vmem:[%s5855_s1 + $0x46c] sm:$0xf0]  ;;  %v3392_v30 = vor.u32 %v3695_v23, %v3391_v22  ;;  %1802 = vmatpush.bf16.msrb.mxu1 %v3136_v25  ;;  %v2801_v16 = vld [vmem:[%s5855_s1 + $0x2f0] sm:$0xf0] }
  0x34   :  { %v3119_v29 = vld [vmem:[%s5855_s1 + $0x560] sm:$0xf]  ;;  %v3627_v31 = vld [vmem:[%s5855_s1 + $0x56c] sm:$0xf0]  ;;  %v2992_v36 = vor.u32 %v3595_v28, %v2991_v27  ;;  %1816 = vmatpush.bf16.msrb.mxu2 %v3264_v26  ;;  %v3577_v18 = vld [vmem:[%s5855_s1 + $0x3e4] sm:$0xf] }
  0x35   :  { %v3247_v32 = vld [vmem:[%s5855_s1 + $0x660] sm:$0xf]  ;;  %v3659_v33 = vld [vmem:[%s5855_s1 + $0x66c] sm:$0xf0]  ;;  %v3120_v37 = vor.u32 %v3627_v31, %v3119_v29  ;;  %1830 = vmatpush.bf16.msrb.mxu3 %v3392_v30  ;;  %v2929_v20 = vld [vmem:[%s5855_s1 + $0x3f0] sm:$0xf0]  ;;  %v2548_v29 = vor.u32 %v3481_v9, %v2545_v12 }
  0x36   :  { %v3375_v34 = vld [vmem:[%s5855_s1 + $0x760] sm:$0xf]  ;;  %v3691_v35 = vld [vmem:[%s5855_s1 + $0x76c] sm:$0xf0]  ;;  %v3248_v38 = vor.u32 %v3659_v33, %v3247_v32  ;;  %1789 = vmatpush.bf16.msrb.mxu0 %v2992_v36  ;;  %v33_v27 = vld [vmem:[%s5856_s0 + $0x28] sm:$0xff]  ;;  %v2676_v33 = vor.u32 %v3513_v13, %v2673_v14 }
  0x37   :  { %v2975_v39 = vld [vmem:[%s5855_s1 + $0x440] sm:$0xf]  ;;  %v3591_v40 = vld [vmem:[%s5855_s1 + $0x44c] sm:$0xf0]  ;;  %v3376_v42 = vor.u32 %v3691_v35, %v3375_v34  ;;  %1803 = vmatpush.bf16.msrb.mxu1 %v3120_v37  ;;  %v41_v30 = vld [vmem:[%s5856_s0 + $0x68] sm:$0xff]  ;;  %v2804_v34 = vor.u32 %v3545_v15, %v2801_v16 }
  0x38   :  { %v3103_v41 = vld [vmem:[%s5855_s1 + $0x540] sm:$0xf]  ;;  %v3623_v43 = vld [vmem:[%s5855_s1 + $0x54c] sm:$0xf0]  ;;  %v2976_v48 = vor.u32 %v3591_v40, %v2975_v39  ;;  %1817 = vmatpush.bf16.msrb.mxu2 %v3248_v38  ;;  %v35_v31 = vld [vmem:[%s5856_s0 + $0x38] sm:$0xff]  ;;  %v2932_v38 = vor.u32 %v3577_v18, %v2929_v20 }
  0x39   :  { %v3231_v44 = vld [vmem:[%s5855_s1 + $0x640] sm:$0xf]  ;;  %v3655_v45 = vld [vmem:[%s5855_s1 + $0x64c] sm:$0xf0]  ;;  %v3104_v50 = vor.u32 %v3623_v43, %v3103_v41  ;;  %1831 = vmatpush.bf16.msrb.mxu3 %v3376_v42  ;;  %v43_v32 = vld [vmem:[%s5856_s0 + $0x78] sm:$0xff] }
  0x3a   :  { %v3359_v46 = vld [vmem:[%s5855_s1 + $0x740] sm:$0xf]  ;;  %v3687_v47 = vld [vmem:[%s5855_s1 + $0x74c] sm:$0xf0]  ;;  %v3232_v51 = vor.u32 %v3655_v45, %v3231_v44  ;;  %1790 = vmatpush.bf16.msrb.mxu0 %v2976_v48  ;;  %v3477_v35 = vld [vmem:[%s5855_s1 + $0xc4] sm:$0xf]  ;;  %v4240_v44 = vpack.c.bf16 %v41_v30, %v33_v27 }
  0x3b   :  { %v2959_v49 = vld [vmem:[%s5855_s1 + $0x420] sm:$0xf]  ;;  %v3587_v52 = vld [vmem:[%s5855_s1 + $0x42c] sm:$0xf0]  ;;  %v3360_v55 = vor.u32 %v3687_v47, %v3359_v46  ;;  %1804 = vmatpush.bf16.msrb.mxu1 %v3104_v50  ;;  %v2529_v36 = vld [vmem:[%s5855_s1 + $0xd0] sm:$0xf0]  ;;  %v4248_v47 = vpack.c.bf16 %v43_v32, %v35_v31 }
  0x3c   :  { %v3087_v53 = vld [vmem:[%s5855_s1 + $0x520] sm:$0xf]  ;;  %v3619_v54 = vld [vmem:[%s5855_s1 + $0x52c] sm:$0xf0]  ;;  %v2960_v63 = vor.u32 %v3587_v52, %v2959_v49  ;;  %1818 = vmatpush.bf16.msrb.mxu2 %v3232_v51  ;;  %v3509_v37 = vld [vmem:[%s5855_s1 + $0x1c4] sm:$0xf]  ;;  %v2532_v48 = vor.u32 %v3477_v35, %v2529_v36 }
  0x3d   :  { %v3215_v56 = vld [vmem:[%s5855_s1 + $0x620] sm:$0xf]  ;;  %v3651_v57 = vld [vmem:[%s5855_s1 + $0x62c] sm:$0xf0]  ;;  %v3088_v5 = vor.u32 %v3619_v54, %v3087_v53  ;;  %1832 = vmatpush.bf16.msrb.mxu3 %v3360_v55  ;;  %v2657_v40 = vld [vmem:[%s5855_s1 + $0x1d0] sm:$0xf0] }
  0x3e   :  { %v3343_v59 = vld [vmem:[%s5855_s1 + $0x720] sm:$0xf]  ;;  %v3683_v60 = vld [vmem:[%s5855_s1 + $0x72c] sm:$0xf0]  ;;  %v3216_v6 = vor.u32 %v3651_v57, %v3215_v56  ;;  %1791 = vmatpush.bf16.msrb.mxu0 %v2960_v63  ;;  %v3541_v41 = vld [vmem:[%s5855_s1 + $0x2c4] sm:$0xf]  ;;  %v2660_v49 = vor.u32 %v3509_v37, %v2657_v40 }
  0x3f   :  { %v2943_v61 = vld [vmem:[%s5855_s1 + $0x400] sm:$0xf]  ;;  %v3583_v62 = vld [vmem:[%s5855_s1 + $0x40c] sm:$0xf0]  ;;  %v3344_v11 = vor.u32 %v3683_v60, %v3343_v59  ;;  %1805 = vmatpush.bf16.msrb.mxu1 %v3088_v5  ;;  %v2785_v42 = vld [vmem:[%s5855_s1 + $0x2d0] sm:$0xf0] }
  0x40   :  { %v3071_v0 = vld [vmem:[%s5855_s1 + $0x500] sm:$0xf]  ;;  %v3615_v2 = vld [vmem:[%s5855_s1 + $0x50c] sm:$0xf0]  ;;  %v2944_v19 = vor.u32 %v3583_v62, %v2943_v61  ;;  %1819 = vmatpush.bf16.msrb.mxu2 %v3216_v6  ;;  %v3573_v45 = vld [vmem:[%s5855_s1 + $0x3c4] sm:$0xf]  ;;  %v2788_v50 = vor.u32 %v3541_v41, %v2785_v42 }
  0x41   :  { %v3199_v3 = vld [vmem:[%s5855_s1 + $0x600] sm:$0xf]  ;;  %v3647_v4 = vld [vmem:[%s5855_s1 + $0x60c] sm:$0xf0]  ;;  %v3072_v23 = vor.u32 %v3615_v2, %v3071_v0  ;;  %1833 = vmatpush.bf16.msrb.mxu3 %v3344_v11  ;;  %v2913_v46 = vld [vmem:[%s5855_s1 + $0x3d0] sm:$0xf0] }
  0x42   :  { %v3327_v7 = vld [vmem:[%s5855_s1 + $0x700] sm:$0xf]  ;;  %v3679_v8 = vld [vmem:[%s5855_s1 + $0x70c] sm:$0xf0]  ;;  %v3200_v24 = vor.u32 %v3647_v4, %v3199_v3  ;;  %1792 = vmatpush.bf16.msrb.mxu0 %v2944_v19  ;;  %v3473_v51 = vld [vmem:[%s5855_s1 + $0xa4] sm:$0xf]  ;;  %v2916_v54 = vor.u32 %v3573_v45, %v2913_v46 }
  0x43   :  { %v32_v21 = vld [vmem:[%s5856_s0 + $0x20] sm:$0xff]  ;;  %v34_v25 = vld [vmem:[%s5856_s0 + $0x30] sm:$0xff]  ;;  %v3328_v28 = vor.u32 %v3679_v8, %v3327_v7  ;;  %1806 = vmatpush.bf16.msrb.mxu1 %v3072_v23 }
  0x44   :  { %v40_v22 = vld [vmem:[%s5856_s0 + $0x60] sm:$0xff]  ;;  %v42_v26 = vld [vmem:[%s5856_s0 + $0x70] sm:$0xff]  ;;  %1820 = vmatpush.bf16.msrb.mxu2 %v3200_v24 }
  0x45   :  { %v4227_v39 = vpack.c.bf16 %v40_v22, %v32_v21  ;;  %v4238_v43 = vpack.c.bf16 %v42_v26, %v34_v25  ;;  %1834 = vmatpush.bf16.msrb.mxu3 %v3328_v28  ;;  %v2513_v52 = vld [vmem:[%s5855_s1 + $0xb0] sm:$0xf0]  ;;  %v3505_v53 = vld [vmem:[%s5855_s1 + $0x1a4] sm:$0xf] }
  0x46   :  { %1841 = vmatpush.bf16.msra.mxu0 %v2548_v29  ;;  %v2641_v55 = vld [vmem:[%s5855_s1 + $0x1b0] sm:$0xf0]  ;;  %v3537_v56 = vld [vmem:[%s5855_s1 + $0x2a4] sm:$0xf]  ;;  %1807 = vmatmul.bf16.vlgmr.msrb.gmra.mxu1 %v4240_v44  ;;  %v2516_v61 = vor.u32 %v3473_v51, %v2513_v52 }
  0x47   :  { %1855 = vmatpush.bf16.msra.mxu1 %v2676_v33  ;;  %1793 = vmatmul.bf16.vlgmr.msrb.gmra.mxu0 %v4227_v39  ;;  %v2769_v57 = vld [vmem:[%s5855_s1 + $0x2b0] sm:$0xf0]  ;;  %v3569_v59 = vld [vmem:[%s5855_s1 + $0x3a4] sm:$0xf]  ;;  %v2644_v62 = vor.u32 %v3505_v53, %v2641_v55 }
  0x48   :  { %1869 = vmatpush.bf16.msra.mxu2 %v2804_v34  ;;  %v2897_v60 = vld [vmem:[%s5855_s1 + $0x3b0] sm:$0xf0]  ;;  %1835 = vmatmul.bf16.vlgmr.msrb.gmra.mxu3 %v4248_v47  ;;  %v2772_v63 = vor.u32 %v3537_v56, %v2769_v57  ;;  %v3469_v0 = vld [vmem:[%s5855_s1 + $0x84] sm:$0xf] }
  0x49   :  { %1883 = vmatpush.bf16.msra.mxu3 %v2932_v38  ;;  %1821 = vmatmul.bf16.vlgmr.msrb.gmra.mxu2 %v4238_v43  ;;  %v2497_v2 = vld [vmem:[%s5855_s1 + $0x90] sm:$0xf0]  ;;  %v3501_v3 = vld [vmem:[%s5855_s1 + $0x184] sm:$0xf]  ;;  %v2900_v4 = vor.u32 %v3569_v59, %v2897_v60 }
  0x4a   :  { %1842 = vmatpush.bf16.msra.mxu0 %v2532_v48  ;;  %v2625_v5 = vld [vmem:[%s5855_s1 + $0x190] sm:$0xf0]  ;;  %v3533_v6 = vld [vmem:[%s5855_s1 + $0x284] sm:$0xf]  ;;  %v2500_v11 = vor.u32 %v3469_v0, %v2497_v2 }
  0x4b   :  { %1856 = vmatpush.bf16.msra.mxu1 %v2660_v49  ;;  %v2753_v7 = vld [vmem:[%s5855_s1 + $0x290] sm:$0xf0]  ;;  %v3565_v8 = vld [vmem:[%s5855_s1 + $0x384] sm:$0xf]  ;;  %v2628_v12 = vor.u32 %v3501_v3, %v2625_v5 }
  0x4c   :  { %1870 = vmatpush.bf16.msra.mxu2 %v2788_v50  ;;  %v2881_v9 = vld [vmem:[%s5855_s1 + $0x390] sm:$0xf0]  ;;  %v2756_v13 = vor.u32 %v3533_v6, %v2753_v7  ;;  %v3465_v14 = vld [vmem:[%s5855_s1 + $0x64] sm:$0xf] }
  0x4d   :  { %1884 = vmatpush.bf16.msra.mxu3 %v2916_v54  ;;  %v2481_v15 = vld [vmem:[%s5855_s1 + $0x70] sm:$0xf0]  ;;  %v3497_v16 = vld [vmem:[%s5855_s1 + $0x164] sm:$0xf]  ;;  %v2884_v18 = vor.u32 %v3565_v8, %v2881_v9 }
  0x4e   :  { %1843 = vmatpush.bf16.msra.mxu0 %v2516_v61  ;;  %v2609_v19 = vld [vmem:[%s5855_s1 + $0x170] sm:$0xf0]  ;;  %v3529_v20 = vld [vmem:[%s5855_s1 + $0x264] sm:$0xf]  ;;  %v2484_v24 = vor.u32 %v3465_v14, %v2481_v15 }
  0x4f   :  { %1857 = vmatpush.bf16.msra.mxu1 %v2644_v62  ;;  %v2737_v21 = vld [vmem:[%s5855_s1 + $0x270] sm:$0xf0]  ;;  %v3561_v22 = vld [vmem:[%s5855_s1 + $0x364] sm:$0xf]  ;;  %v2612_v25 = vor.u32 %v3497_v16, %v2609_v19 }
  0x50   :  { %1871 = vmatpush.bf16.msra.mxu2 %v2772_v63  ;;  %v2865_v23 = vld [vmem:[%s5855_s1 + $0x370] sm:$0xf0]  ;;  %v2740_v26 = vor.u32 %v3529_v20, %v2737_v21  ;;  %v3461_v27 = vld [vmem:[%s5855_s1 + $0x44] sm:$0xf] }
  0x51   :  { %1885 = vmatpush.bf16.msra.mxu3 %v2900_v4  ;;  %v2465_v28 = vld [vmem:[%s5855_s1 + $0x50] sm:$0xf0]  ;;  %v3493_v29 = vld [vmem:[%s5855_s1 + $0x144] sm:$0xf]  ;;  %v2868_v30 = vor.u32 %v3561_v22, %v2865_v23 }
  0x52   :  { %1844 = vmatpush.bf16.msra.mxu0 %v2500_v11  ;;  %v2593_v31 = vld [vmem:[%s5855_s1 + $0x150] sm:$0xf0]  ;;  %v3525_v32 = vld [vmem:[%s5855_s1 + $0x244] sm:$0xf]  ;;  %v2468_v36 = vor.u32 %v3461_v27, %v2465_v28 }
  0x53   :  { %1858 = vmatpush.bf16.msra.mxu1 %v2628_v12  ;;  %v2721_v33 = vld [vmem:[%s5855_s1 + $0x250] sm:$0xf0]  ;;  %v3557_v34 = vld [vmem:[%s5855_s1 + $0x344] sm:$0xf]  ;;  %v2596_v37 = vor.u32 %v3493_v29, %v2593_v31 }
  0x54   :  { %1872 = vmatpush.bf16.msra.mxu2 %v2756_v13  ;;  %v2849_v35 = vld [vmem:[%s5855_s1 + $0x350] sm:$0xf0]  ;;  %v2724_v38 = vor.u32 %v3525_v32, %v2721_v33  ;;  %v3457_v40 = vld [vmem:[%s5855_s1 + $0x24] sm:$0xf] }
  0x55   :  { %1886 = vmatpush.bf16.msra.mxu3 %v2884_v18  ;;  %v2449_v41 = vld [vmem:[%s5855_s1 + $0x30] sm:$0xf0]  ;;  %v3489_v42 = vld [vmem:[%s5855_s1 + $0x124] sm:$0xf]  ;;  %v2852_v45 = vor.u32 %v3557_v34, %v2849_v35 }
  0x56   :  { %1845 = vmatpush.bf16.msra.mxu0 %v2484_v24  ;;  %v2577_v46 = vld [vmem:[%s5855_s1 + $0x130] sm:$0xf0]  ;;  %v3521_v48 = vld [vmem:[%s5855_s1 + $0x224] sm:$0xf]  ;;  %v2452_v52 = vor.u32 %v3457_v40, %v2449_v41 }
  0x57   :  { %1859 = vmatpush.bf16.msra.mxu1 %v2612_v25  ;;  %v2705_v49 = vld [vmem:[%s5855_s1 + $0x230] sm:$0xf0]  ;;  %v3553_v50 = vld [vmem:[%s5855_s1 + $0x324] sm:$0xf]  ;;  %v2580_v55 = vor.u32 %v3489_v42, %v2577_v46 }
  0x58   :  { %1873 = vmatpush.bf16.msra.mxu2 %v2740_v26  ;;  %v2833_v51 = vld [vmem:[%s5855_s1 + $0x330] sm:$0xf0]  ;;  %v3453_v53 = vld [vmem:[%s5855_s1 + $0x4] sm:$0xf]  ;;  %v2708_v56 = vor.u32 %v3521_v48, %v2705_v49 }
  0x59   :  { %1887 = vmatpush.bf16.msra.mxu3 %v2868_v30  ;;  %v2433_v54 = vld [vmem:[%s5855_s1 + $0x10] sm:$0xf0]  ;;  %v3485_v57 = vld [vmem:[%s5855_s1 + $0x104] sm:$0xf]  ;;  %v2836_v61 = vor.u32 %v3553_v50, %v2833_v51 }
  0x5a   :  { %1846 = vmatpush.bf16.msra.mxu0 %v2468_v36  ;;  %v2561_v59 = vld [vmem:[%s5855_s1 + $0x110] sm:$0xf0]  ;;  %v3517_v60 = vld [vmem:[%s5855_s1 + $0x204] sm:$0xf]  ;;  %v2436_v5 = vor.u32 %v3453_v53, %v2433_v54 }
  0x5b   :  { %1860 = vmatpush.bf16.msra.mxu1 %v2596_v37  ;;  %v2689_v62 = vld [vmem:[%s5855_s1 + $0x210] sm:$0xf0]  ;;  %v3549_v63 = vld [vmem:[%s5855_s1 + $0x304] sm:$0xf]  ;;  %v2564_v9 = vor.u32 %v3485_v57, %v2561_v59 }
  0x5c   :  { %1874 = vmatpush.bf16.msra.mxu2 %v2724_v38  ;;  %v2817_v0 = vld [vmem:[%s5855_s1 + $0x310] sm:$0xf0]  ;;  %v3609_v2 = vld [vmem:[%s5855_s1 + $0x4e4] sm:$0xf]  ;;  %v2692_v11 = vor.u32 %v3517_v60, %v2689_v62 }
  0x5d   :  { %1888 = vmatpush.bf16.msra.mxu3 %v2852_v45  ;;  %v3057_v3 = vld [vmem:[%s5855_s1 + $0x4f0] sm:$0xf0]  ;;  %v3641_v4 = vld [vmem:[%s5855_s1 + $0x5e4] sm:$0xf]  ;;  %v2820_v14 = vor.u32 %v3549_v63, %v2817_v0 }
  0x5e   :  { %1847 = vmatpush.bf16.msra.mxu0 %v2452_v52  ;;  %v3185_v6 = vld [vmem:[%s5855_s1 + $0x5f0] sm:$0xf0]  ;;  %v3673_v7 = vld [vmem:[%s5855_s1 + $0x6e4] sm:$0xf]  ;;  %v3060_v15 = vor.u32 %v3609_v2, %v3057_v3 }
  0x5f   :  { %v3313_v8 = vld [vmem:[%s5855_s1 + $0x6f0] sm:$0xf0]  ;;  %1861 = vmatpush.bf16.msra.mxu1 %v2580_v55  ;;  %v3705_v12 = vld [vmem:[%s5855_s1 + $0x7e4] sm:$0xf]  ;;  %v3188_v16 = vor.u32 %v3641_v4, %v3185_v6 }
  0x60   :  { %1875 = vmatpush.bf16.msra.mxu2 %v2708_v56  ;;  %v3441_v13 = vld [vmem:[%s5855_s1 + $0x7f0] sm:$0xf0]  ;;  %v3316_v18 = vor.u32 %v3673_v7, %v3313_v8  ;;  %v3605_v19 = vld [vmem:[%s5855_s1 + $0x4c4] sm:$0xf] }
  0x61   :  { %1889 = vmatpush.bf16.msra.mxu3 %v2836_v61  ;;  %v3041_v20 = vld [vmem:[%s5855_s1 + $0x4d0] sm:$0xf0]  ;;  %v3637_v21 = vld [vmem:[%s5855_s1 + $0x5c4] sm:$0xf]  ;;  %v3444_v22 = vor.u32 %v3705_v12, %v3441_v13 }
  0x62   :  { %1848 = vmatpush.bf16.msra.mxu0 %v2436_v5  ;;  %v3169_v23 = vld [vmem:[%s5855_s1 + $0x5d0] sm:$0xf0]  ;;  %v3669_v24 = vld [vmem:[%s5855_s1 + $0x6c4] sm:$0xf]  ;;  %v3044_v28 = vor.u32 %v3605_v19, %v3041_v20 }
  0x63   :  { %v3297_v25 = vld [vmem:[%s5855_s1 + $0x6d0] sm:$0xf0]  ;;  %1862 = vmatpush.bf16.msra.mxu1 %v2564_v9  ;;  %v3701_v26 = vld [vmem:[%s5855_s1 + $0x7c4] sm:$0xf]  ;;  %v3172_v29 = vor.u32 %v3637_v21, %v3169_v23 }
  0x64   :  { %1876 = vmatpush.bf16.msra.mxu2 %v2692_v11  ;;  %v3425_v27 = vld [vmem:[%s5855_s1 + $0x7d0] sm:$0xf0]  ;;  %v3300_v30 = vor.u32 %v3669_v24, %v3297_v25  ;;  %v3601_v31 = vld [vmem:[%s5855_s1 + $0x4a4] sm:$0xf] }
  0x65   :  { %1890 = vmatpush.bf16.msra.mxu3 %v2820_v14  ;;  %v3025_v32 = vld [vmem:[%s5855_s1 + $0x4b0] sm:$0xf0]  ;;  %v3633_v33 = vld [vmem:[%s5855_s1 + $0x5a4] sm:$0xf]  ;;  %v3428_v34 = vor.u32 %v3701_v26, %v3425_v27  ;;  %1849 = vmatmul.bf16.vlgmr.msra.gmra.mxu0 %v4005_v58 }
  0x66   :  { %1897 = vmatpush.bf16.msrb.mxu0 %v3060_v15  ;;  %v3153_v35 = vld [vmem:[%s5855_s1 + $0x5b0] sm:$0xf0]  ;;  %v3665_v36 = vld [vmem:[%s5855_s1 + $0x6a4] sm:$0xf]  ;;  %1863 = vmatmul.bf16.vlgmr.msra.gmra.mxu1 %v4041_v10  ;;  %v3028_v41 = vor.u32 %v3601_v31, %v3025_v32 }
  0x67   :  { %1911 = vmatpush.bf16.msrb.mxu1 %v3188_v16  ;;  %v3281_v37 = vld [vmem:[%s5855_s1 + $0x6b0] sm:$0xf0]  ;;  %v3697_v38 = vld [vmem:[%s5855_s1 + $0x7a4] sm:$0xf]  ;;  %1877 = vmatmul.bf16.vlgmr.msra.gmra.mxu2 %v4019_v1  ;;  %v3156_v42 = vor.u32 %v3633_v33, %v3153_v35 }
  0x68   :  { %1925 = vmatpush.bf16.msrb.mxu2 %v3316_v18  ;;  %v3409_v40 = vld [vmem:[%s5855_s1 + $0x7b0] sm:$0xf0]  ;;  %1891 = vmatmul.bf16.vlgmr.msra.gmra.mxu3 %v4055_v17  ;;  %v3284_v45 = vor.u32 %v3665_v36, %v3281_v37  ;;  %v3597_v46 = vld [vmem:[%s5855_s1 + $0x484] sm:$0xf] }
  0x69   :  { %1939 = vmatpush.bf16.msrb.mxu3 %v3444_v22  ;;  %v3009_v48 = vld [vmem:[%s5855_s1 + $0x490] sm:$0xf0]  ;;  %v3629_v49 = vld [vmem:[%s5855_s1 + $0x584] sm:$0xf]  ;;  %v3412_v50 = vor.u32 %v3697_v38, %v3409_v40 }
  0x6a   :  { %1898 = vmatpush.bf16.msrb.mxu0 %v3044_v28  ;;  %v3137_v51 = vld [vmem:[%s5855_s1 + $0x590] sm:$0xf0]  ;;  %v3661_v52 = vld [vmem:[%s5855_s1 + $0x684] sm:$0xf]  ;;  %v3012_v56 = vor.u32 %v3597_v46, %v3009_v48  ;;  %v2551_v48 = vld [vmem:[%s5855_s1 + $0xe8] sm:$0xf] }
  0x6b   :  { %1912 = vmatpush.bf16.msrb.mxu1 %v3172_v29  ;;  %v3265_v53 = vld [vmem:[%s5855_s1 + $0x690] sm:$0xf0]  ;;  %v3693_v54 = vld [vmem:[%s5855_s1 + $0x784] sm:$0xf]  ;;  %v3140_v57 = vor.u32 %v3629_v49, %v3137_v51  ;;  %v3484_v49 = vld [vmem:[%s5855_s1 + $0xf4] sm:$0xf0] }
  0x6c   :  { %1926 = vmatpush.bf16.msrb.mxu2 %v3300_v30  ;;  %v3393_v55 = vld [vmem:[%s5855_s1 + $0x790] sm:$0xf0]  ;;  %v3268_v59 = vor.u32 %v3661_v52, %v3265_v53  ;;  %v3593_v60 = vld [vmem:[%s5855_s1 + $0x464] sm:$0xf]  ;;  %v3516_v52 = vld [vmem:[%s5855_s1 + $0x1f4] sm:$0xf0] }
  0x6d   :  { %1940 = vmatpush.bf16.msrb.mxu3 %v3428_v34  ;;  %v2993_v61 = vld [vmem:[%s5855_s1 + $0x470] sm:$0xf0]  ;;  %v3625_v62 = vld [vmem:[%s5855_s1 + $0x564] sm:$0xf]  ;;  %v3396_v63 = vor.u32 %v3693_v54, %v3393_v55  ;;  %v2807_v53 = vld [vmem:[%s5855_s1 + $0x2e8] sm:$0xf] }
  0x6e   :  { %1899 = vmatpush.bf16.msrb.mxu0 %v3028_v41  ;;  %v3121_v0 = vld [vmem:[%s5855_s1 + $0x570] sm:$0xf0]  ;;  %v3657_v2 = vld [vmem:[%s5855_s1 + $0x664] sm:$0xf]  ;;  %v2996_v6 = vor.u32 %v3593_v60, %v2993_v61  ;;  %v3548_v54 = vld [vmem:[%s5855_s1 + $0x2f4] sm:$0xf0]  ;;  %v2552_v61 = vor.u32 %v3484_v49, %v2551_v48 }
  0x6f   :  { %1913 = vmatpush.bf16.msrb.mxu1 %v3156_v42  ;;  %v3249_v3 = vld [vmem:[%s5855_s1 + $0x670] sm:$0xf0]  ;;  %v3689_v4 = vld [vmem:[%s5855_s1 + $0x764] sm:$0xf]  ;;  %v3124_v7 = vor.u32 %v3625_v62, %v3121_v0  ;;  %v2535_v0 = vld [vmem:[%s5855_s1 + $0xc8] sm:$0xf] }
  0x70   :  { %1927 = vmatpush.bf16.msrb.mxu2 %v3284_v45  ;;  %v3377_v5 = vld [vmem:[%s5855_s1 + $0x770] sm:$0xf0]  ;;  %v3252_v8 = vor.u32 %v3657_v2, %v3249_v3  ;;  %v3589_v9 = vld [vmem:[%s5855_s1 + $0x444] sm:$0xf]  ;;  %v3480_v2 = vld [vmem:[%s5855_s1 + $0xd4] sm:$0xf0] }
  0x71   :  { %1941 = vmatpush.bf16.msrb.mxu3 %v3412_v50  ;;  %v2977_v11 = vld [vmem:[%s5855_s1 + $0x450] sm:$0xf0]  ;;  %v3621_v12 = vld [vmem:[%s5855_s1 + $0x544] sm:$0xf]  ;;  %v3380_v13 = vor.u32 %v3689_v4, %v3377_v5  ;;  %v2679_v50 = vld [vmem:[%s5855_s1 + $0x1e8] sm:$0xf] }
  0x72   :  { %1900 = vmatpush.bf16.msrb.mxu0 %v3012_v56  ;;  %v3105_v14 = vld [vmem:[%s5855_s1 + $0x550] sm:$0xf0]  ;;  %v3653_v15 = vld [vmem:[%s5855_s1 + $0x644] sm:$0xf]  ;;  %v2980_v20 = vor.u32 %v3589_v9, %v2977_v11  ;;  %v2680_v62 = vor.u32 %v3516_v52, %v2679_v50  ;;  %v2663_v3 = vld [vmem:[%s5855_s1 + $0x1c8] sm:$0xf]  ;;  %v2536_v11 = vor.u32 %v3480_v2, %v2535_v0 }
  0x73   :  { %1914 = vmatpush.bf16.msrb.mxu1 %v3140_v57  ;;  %v3233_v16 = vld [vmem:[%s5855_s1 + $0x650] sm:$0xf0]  ;;  %v3685_v18 = vld [vmem:[%s5855_s1 + $0x744] sm:$0xf]  ;;  %v3108_v21 = vor.u32 %v3621_v12, %v3105_v14  ;;  %v2935_v57 = vld [vmem:[%s5855_s1 + $0x3e8] sm:$0xf] }
  0x74   :  { %1928 = vmatpush.bf16.msrb.mxu2 %v3268_v59  ;;  %v3361_v19 = vld [vmem:[%s5855_s1 + $0x750] sm:$0xf0]  ;;  %v3236_v22 = vor.u32 %v3653_v15, %v3233_v16  ;;  %v3585_v23 = vld [vmem:[%s5855_s1 + $0x424] sm:$0xf]  ;;  %v3580_v59 = vld [vmem:[%s5855_s1 + $0x3f4] sm:$0xf0] }
  0x75   :  { %1942 = vmatpush.bf16.msrb.mxu3 %v3396_v63  ;;  %v2961_v24 = vld [vmem:[%s5855_s1 + $0x430] sm:$0xf0]  ;;  %v3617_v25 = vld [vmem:[%s5855_s1 + $0x524] sm:$0xf]  ;;  %v3364_v26 = vor.u32 %v3685_v18, %v3361_v19  ;;  %v2808_v63 = vor.u32 %v3548_v54, %v2807_v53  ;;  %v2936_v4 = vor.u32 %v3580_v59, %v2935_v57  ;;  %v3512_v5 = vld [vmem:[%s5855_s1 + $0x1d4] sm:$0xf0] }
  0x76   :  { %1901 = vmatpush.bf16.msrb.mxu0 %v2996_v6  ;;  %v3089_v27 = vld [vmem:[%s5855_s1 + $0x530] sm:$0xf0]  ;;  %v3649_v28 = vld [vmem:[%s5855_s1 + $0x624] sm:$0xf]  ;;  %v2964_v32 = vor.u32 %v3585_v23, %v2961_v24  ;;  %v2791_v6 = vld [vmem:[%s5855_s1 + $0x2c8] sm:$0xf]  ;;  %v2664_v12 = vor.u32 %v3512_v5, %v2663_v3 }
  0x77   :  { %1915 = vmatpush.bf16.msrb.mxu1 %v3124_v7  ;;  %v3217_v29 = vld [vmem:[%s5855_s1 + $0x630] sm:$0xf0]  ;;  %v3681_v30 = vld [vmem:[%s5855_s1 + $0x724] sm:$0xf]  ;;  %v3092_v35 = vor.u32 %v3617_v25, %v3089_v27  ;;  %v3544_v7 = vld [vmem:[%s5855_s1 + $0x2d4] sm:$0xf0] }
  0x78   :  { %1929 = vmatpush.bf16.msrb.mxu2 %v3252_v8  ;;  %v3345_v31 = vld [vmem:[%s5855_s1 + $0x730] sm:$0xf0]  ;;  %v3581_v33 = vld [vmem:[%s5855_s1 + $0x404] sm:$0xf]  ;;  %v3220_v36 = vor.u32 %v3649_v28, %v3217_v29  ;;  %v2919_v8 = vld [vmem:[%s5855_s1 + $0x3c8] sm:$0xf] }
  0x79   :  { %1943 = vmatpush.bf16.msrb.mxu3 %v3380_v13  ;;  %v2945_v34 = vld [vmem:[%s5855_s1 + $0x410] sm:$0xf0]  ;;  %v3613_v37 = vld [vmem:[%s5855_s1 + $0x504] sm:$0xf]  ;;  %v3348_v41 = vor.u32 %v3681_v30, %v3345_v31  ;;  %v3576_v9 = vld [vmem:[%s5855_s1 + $0x3d4] sm:$0xf0]  ;;  %v2792_v13 = vor.u32 %v3544_v7, %v2791_v6 }
  0x7a   :  { %1902 = vmatpush.bf16.msrb.mxu0 %v2980_v20  ;;  %v3073_v38 = vld [vmem:[%s5855_s1 + $0x510] sm:$0xf0]  ;;  %v3645_v40 = vld [vmem:[%s5855_s1 + $0x604] sm:$0xf]  ;;  %v2948_v51 = vor.u32 %v3581_v33, %v2945_v34  ;;  %v2519_v14 = vld [vmem:[%s5855_s1 + $0xa8] sm:$0xf]  ;;  %v2920_v18 = vor.u32 %v3576_v9, %v2919_v8 }
  0x7b   :  { %1916 = vmatpush.bf16.msrb.mxu1 %v3108_v21  ;;  %v3201_v42 = vld [vmem:[%s5855_s1 + $0x610] sm:$0xf0]  ;;  %v3677_v45 = vld [vmem:[%s5855_s1 + $0x704] sm:$0xf]  ;;  %v3076_v55 = vor.u32 %v3613_v37, %v3073_v38  ;;  %v3476_v15 = vld [vmem:[%s5855_s1 + $0xb4] sm:$0xf0] }
  0x7c   :  { %1930 = vmatpush.bf16.msrb.mxu2 %v3236_v22  ;;  %v3329_v46 = vld [vmem:[%s5855_s1 + $0x710] sm:$0xf0]  ;;  %v3204_v56 = vor.u32 %v3645_v40, %v3201_v42  ;;  %v2647_v16 = vld [vmem:[%s5855_s1 + $0x1a8] sm:$0xf]  ;;  %v3508_v19 = vld [vmem:[%s5855_s1 + $0x1b4] sm:$0xf0]  ;;  %v2520_v24 = vor.u32 %v3476_v15, %v2519_v14 }
  0x7d   :  { %1944 = vmatpush.bf16.msrb.mxu3 %v3364_v26  ;;  %v3332_v60 = vor.u32 %v3677_v45, %v3329_v46  ;;  %v2775_v20 = vld [vmem:[%s5855_s1 + $0x2a8] sm:$0xf]  ;;  %v3540_v21 = vld [vmem:[%s5855_s1 + $0x2b4] sm:$0xf0]  ;;  %v2648_v25 = vor.u32 %v3508_v19, %v2647_v16 }
  0x7e   :  { %1903 = vmatpush.bf16.msrb.mxu0 %v2964_v32  ;;  %v2903_v22 = vld [vmem:[%s5855_s1 + $0x3a8] sm:$0xf]  ;;  %v3572_v23 = vld [vmem:[%s5855_s1 + $0x3b4] sm:$0xf0]  ;;  %v2776_v26 = vor.u32 %v3540_v21, %v2775_v20 }
  0x7f   :  { %1917 = vmatpush.bf16.msrb.mxu1 %v3092_v35  ;;  %v2503_v27 = vld [vmem:[%s5855_s1 + $0x88] sm:$0xf]  ;;  %v3472_v28 = vld [vmem:[%s5855_s1 + $0x94] sm:$0xf0]  ;;  %v2904_v30 = vor.u32 %v3572_v23, %v2903_v22 }
  0x80   :  { %1931 = vmatpush.bf16.msrb.mxu2 %v3220_v36  ;;  %v2631_v29 = vld [vmem:[%s5855_s1 + $0x188] sm:$0xf]  ;;  %v3504_v31 = vld [vmem:[%s5855_s1 + $0x194] sm:$0xf0]  ;;  %v2504_v36 = vor.u32 %v3472_v28, %v2503_v27 }
  0x81   :  { %1945 = vmatpush.bf16.msrb.mxu3 %v3348_v41  ;;  %v2759_v32 = vld [vmem:[%s5855_s1 + $0x288] sm:$0xf]  ;;  %v3536_v33 = vld [vmem:[%s5855_s1 + $0x294] sm:$0xf0]  ;;  %v2632_v37 = vor.u32 %v3504_v31, %v2631_v29 }
  0x82   :  { %1904 = vmatpush.bf16.msrb.mxu0 %v2948_v51  ;;  %v2887_v34 = vld [vmem:[%s5855_s1 + $0x388] sm:$0xf]  ;;  %v3568_v35 = vld [vmem:[%s5855_s1 + $0x394] sm:$0xf0]  ;;  %v2760_v38 = vor.u32 %v3536_v33, %v2759_v32 }
  0x83   :  { %1918 = vmatpush.bf16.msrb.mxu1 %v3076_v55  ;;  %v2487_v40 = vld [vmem:[%s5855_s1 + $0x68] sm:$0xf]  ;;  %v3468_v41 = vld [vmem:[%s5855_s1 + $0x74] sm:$0xf0]  ;;  %v2888_v45 = vor.u32 %v3568_v35, %v2887_v34 }
  0x84   :  { %1932 = vmatpush.bf16.msrb.mxu2 %v3204_v56  ;;  %v2615_v42 = vld [vmem:[%s5855_s1 + $0x168] sm:$0xf]  ;;  %v3500_v46 = vld [vmem:[%s5855_s1 + $0x174] sm:$0xf0]  ;;  %v2488_v52 = vor.u32 %v3468_v41, %v2487_v40 }
  0x85   :  { %1946 = vmatpush.bf16.msrb.mxu3 %v3332_v60  ;;  %1905 = vmatmul.bf16.vlgmr.msrb.gmra.mxu0 %v4227_v39  ;;  %v2743_v48 = vld [vmem:[%s5855_s1 + $0x268] sm:$0xf]  ;;  %v3532_v49 = vld [vmem:[%s5855_s1 + $0x274] sm:$0xf0]  ;;  %v2616_v53 = vor.u32 %v3500_v46, %v2615_v42 }
  0x86   :  { %1953 = vmatpush.bf16.msra.mxu0 %v2552_v61  ;;  %1919 = vmatmul.bf16.vlgmr.msrb.gmra.mxu1 %v4240_v44  ;;  %v2871_v50 = vld [vmem:[%s5855_s1 + $0x368] sm:$0xf]  ;;  %v3564_v51 = vld [vmem:[%s5855_s1 + $0x374] sm:$0xf0]  ;;  %v2744_v54 = vor.u32 %v3532_v49, %v2743_v48 }
  0x87   :  { %1967 = vmatpush.bf16.msra.mxu1 %v2680_v62  ;;  %1933 = vmatmul.bf16.vlgmr.msrb.gmra.mxu2 %v4238_v43  ;;  %v2471_v55 = vld [vmem:[%s5855_s1 + $0x48] sm:$0xf]  ;;  %v3464_v56 = vld [vmem:[%s5855_s1 + $0x54] sm:$0xf0]  ;;  %v2872_v59 = vor.u32 %v3564_v51, %v2871_v50 }
  0x88   :  { %1981 = vmatpush.bf16.msra.mxu2 %v2808_v63  ;;  %1947 = vmatmul.bf16.vlgmr.msrb.gmra.mxu3 %v4248_v47  ;;  %v2599_v57 = vld [vmem:[%s5855_s1 + $0x148] sm:$0xf]  ;;  %v3496_v60 = vld [vmem:[%s5855_s1 + $0x154] sm:$0xf0]  ;;  %v2472_v2 = vor.u32 %v3464_v56, %v2471_v55 }
  0x89   :  { %1995 = vmatpush.bf16.msra.mxu3 %v2936_v4  ;;  %v2727_v61 = vld [vmem:[%s5855_s1 + $0x248] sm:$0xf]  ;;  %v3528_v62 = vld [vmem:[%s5855_s1 + $0x254] sm:$0xf0]  ;;  %v2600_v3 = vor.u32 %v3496_v60, %v2599_v57 }
  0x8a   :  { %1954 = vmatpush.bf16.msra.mxu0 %v2536_v11  ;;  %v2855_v63 = vld [vmem:[%s5855_s1 + $0x348] sm:$0xf]  ;;  %v3560_v0 = vld [vmem:[%s5855_s1 + $0x354] sm:$0xf0]  ;;  %v2728_v4 = vor.u32 %v3528_v62, %v2727_v61 }
  0x8b   :  { %1968 = vmatpush.bf16.msra.mxu1 %v2664_v12  ;;  %v2455_v5 = vld [vmem:[%s5855_s1 + $0x28] sm:$0xf]  ;;  %v3460_v6 = vld [vmem:[%s5855_s1 + $0x34] sm:$0xf0]  ;;  %v2856_v8 = vor.u32 %v3560_v0, %v2855_v63 }
  0x8c   :  { %1982 = vmatpush.bf16.msra.mxu2 %v2792_v13  ;;  %v2583_v7 = vld [vmem:[%s5855_s1 + $0x128] sm:$0xf]  ;;  %v3492_v9 = vld [vmem:[%s5855_s1 + $0x134] sm:$0xf0]  ;;  %v2456_v15 = vor.u32 %v3460_v6, %v2455_v5 }
  0x8d   :  { %1996 = vmatpush.bf16.msra.mxu3 %v2920_v18  ;;  %v2711_v11 = vld [vmem:[%s5855_s1 + $0x228] sm:$0xf]  ;;  %v3524_v12 = vld [vmem:[%s5855_s1 + $0x234] sm:$0xf0]  ;;  %v2584_v19 = vor.u32 %v3492_v9, %v2583_v7 }
  0x8e   :  { %1955 = vmatpush.bf16.msra.mxu0 %v2520_v24  ;;  %v2839_v13 = vld [vmem:[%s5855_s1 + $0x328] sm:$0xf]  ;;  %v3556_v14 = vld [vmem:[%s5855_s1 + $0x334] sm:$0xf0]  ;;  %v2712_v20 = vor.u32 %v3524_v12, %v2711_v11 }
  0x8f   :  { %1969 = vmatpush.bf16.msra.mxu1 %v2648_v25  ;;  %v2439_v16 = vld [vmem:[%s5855_s1 + $0x8] sm:$0xf]  ;;  %v3456_v18 = vld [vmem:[%s5855_s1 + $0x14] sm:$0xf0]  ;;  %v2840_v24 = vor.u32 %v3556_v14, %v2839_v13 }
  0x90   :  { %1983 = vmatpush.bf16.msra.mxu2 %v2776_v26  ;;  %v2567_v21 = vld [vmem:[%s5855_s1 + $0x108] sm:$0xf]  ;;  %v3488_v22 = vld [vmem:[%s5855_s1 + $0x114] sm:$0xf0]  ;;  %v2440_v31 = vor.u32 %v3456_v18, %v2439_v16 }
  0x91   :  { %1997 = vmatpush.bf16.msra.mxu3 %v2904_v30  ;;  %v2695_v23 = vld [vmem:[%s5855_s1 + $0x208] sm:$0xf]  ;;  %v3520_v25 = vld [vmem:[%s5855_s1 + $0x214] sm:$0xf0]  ;;  %v2568_v35 = vor.u32 %v3488_v22, %v2567_v21 }
  0x92   :  { %1956 = vmatpush.bf16.msra.mxu0 %v2504_v36  ;;  %v2823_v26 = vld [vmem:[%s5855_s1 + $0x308] sm:$0xf]  ;;  %v3552_v27 = vld [vmem:[%s5855_s1 + $0x314] sm:$0xf0]  ;;  %v2696_v36 = vor.u32 %v3520_v25, %v2695_v23 }
  0x93   :  { %1970 = vmatpush.bf16.msra.mxu1 %v2632_v37  ;;  %v3063_v28 = vld [vmem:[%s5855_s1 + $0x4e8] sm:$0xf]  ;;  %v3612_v29 = vld [vmem:[%s5855_s1 + $0x4f4] sm:$0xf0]  ;;  %v2824_v40 = vor.u32 %v3552_v27, %v2823_v26 }
  0x94   :  { %1984 = vmatpush.bf16.msra.mxu2 %v2760_v38  ;;  %v3191_v30 = vld [vmem:[%s5855_s1 + $0x5e8] sm:$0xf]  ;;  %v3644_v32 = vld [vmem:[%s5855_s1 + $0x5f4] sm:$0xf0]  ;;  %v3064_v41 = vor.u32 %v3612_v29, %v3063_v28 }
  0x95   :  { %1998 = vmatpush.bf16.msra.mxu3 %v2888_v45  ;;  %v3319_v33 = vld [vmem:[%s5855_s1 + $0x6e8] sm:$0xf]  ;;  %v3676_v34 = vld [vmem:[%s5855_s1 + $0x6f4] sm:$0xf0]  ;;  %v3192_v42 = vor.u32 %v3644_v32, %v3191_v30 }
  0x96   :  { %1957 = vmatpush.bf16.msra.mxu0 %v2488_v52  ;;  %v3447_v37 = vld [vmem:[%s5855_s1 + $0x7e8] sm:$0xf]  ;;  %v3708_v38 = vld [vmem:[%s5855_s1 + $0x7f4] sm:$0xf0]  ;;  %v3320_v45 = vor.u32 %v3676_v34, %v3319_v33 }
  0x97   :  { %1971 = vmatpush.bf16.msra.mxu1 %v2616_v53  ;;  %v3047_v46 = vld [vmem:[%s5855_s1 + $0x4c8] sm:$0xf]  ;;  %v3608_v48 = vld [vmem:[%s5855_s1 + $0x4d4] sm:$0xf0]  ;;  %v3448_v50 = vor.u32 %v3708_v38, %v3447_v37 }
  0x98   :  { %1985 = vmatpush.bf16.msra.mxu2 %v2744_v54  ;;  %v3175_v49 = vld [vmem:[%s5855_s1 + $0x5c8] sm:$0xf]  ;;  %v3640_v51 = vld [vmem:[%s5855_s1 + $0x5d4] sm:$0xf0]  ;;  %v3048_v56 = vor.u32 %v3608_v48, %v3047_v46 }
  0x99   :  { %1999 = vmatpush.bf16.msra.mxu3 %v2872_v59  ;;  %v3303_v52 = vld [vmem:[%s5855_s1 + $0x6c8] sm:$0xf]  ;;  %v3672_v53 = vld [vmem:[%s5855_s1 + $0x6d4] sm:$0xf0]  ;;  %v3176_v57 = vor.u32 %v3640_v51, %v3175_v49 }
  0x9a   :  { %1958 = vmatpush.bf16.msra.mxu0 %v2472_v2  ;;  %v3431_v54 = vld [vmem:[%s5855_s1 + $0x7c8] sm:$0xf]  ;;  %v3704_v55 = vld [vmem:[%s5855_s1 + $0x7d4] sm:$0xf0]  ;;  %v3304_v59 = vor.u32 %v3672_v53, %v3303_v52 }
  0x9b   :  { %1972 = vmatpush.bf16.msra.mxu1 %v2600_v3  ;;  %v3031_v60 = vld [vmem:[%s5855_s1 + $0x4a8] sm:$0xf]  ;;  %v3604_v61 = vld [vmem:[%s5855_s1 + $0x4b4] sm:$0xf0]  ;;  %v3432_v63 = vor.u32 %v3704_v55, %v3431_v54 }
  0x9c   :  { %1986 = vmatpush.bf16.msra.mxu2 %v2728_v4  ;;  %v3159_v62 = vld [vmem:[%s5855_s1 + $0x5a8] sm:$0xf]  ;;  %v3636_v0 = vld [vmem:[%s5855_s1 + $0x5b4] sm:$0xf0]  ;;  %v3032_v6 = vor.u32 %v3604_v61, %v3031_v60 }
  0x9d   :  { %2000 = vmatpush.bf16.msra.mxu3 %v2856_v8  ;;  %v3287_v2 = vld [vmem:[%s5855_s1 + $0x6a8] sm:$0xf]  ;;  %v3668_v3 = vld [vmem:[%s5855_s1 + $0x6b4] sm:$0xf0]  ;;  %v3160_v7 = vor.u32 %v3636_v0, %v3159_v62 }
  0x9e   :  { %1959 = vmatpush.bf16.msra.mxu0 %v2456_v15  ;;  %v3415_v4 = vld [vmem:[%s5855_s1 + $0x7a8] sm:$0xf]  ;;  %v3700_v5 = vld [vmem:[%s5855_s1 + $0x7b4] sm:$0xf0]  ;;  %v3288_v8 = vor.u32 %v3668_v3, %v3287_v2 }
  0x9f   :  { %1973 = vmatpush.bf16.msra.mxu1 %v2584_v19  ;;  %v3015_v9 = vld [vmem:[%s5855_s1 + $0x488] sm:$0xf]  ;;  %v3600_v11 = vld [vmem:[%s5855_s1 + $0x494] sm:$0xf0]  ;;  %v3416_v13 = vor.u32 %v3700_v5, %v3415_v4 }
  0xa0   :  { %1987 = vmatpush.bf16.msra.mxu2 %v2712_v20  ;;  %v3143_v12 = vld [vmem:[%s5855_s1 + $0x588] sm:$0xf]  ;;  %v3632_v14 = vld [vmem:[%s5855_s1 + $0x594] sm:$0xf0]  ;;  %v3016_v20 = vor.u32 %v3600_v11, %v3015_v9  ;;  %v3482_v11 = vld [vmem:[%s5855_s1 + $0xec] sm:$0xf] }
  0xa1   :  { %2001 = vmatpush.bf16.msra.mxu3 %v2840_v24  ;;  %v3271_v15 = vld [vmem:[%s5855_s1 + $0x688] sm:$0xf]  ;;  %v3664_v16 = vld [vmem:[%s5855_s1 + $0x694] sm:$0xf0]  ;;  %v3144_v21 = vor.u32 %v3632_v14, %v3143_v12  ;;  %v2553_v12 = vld [vmem:[%s5855_s1 + $0xf8] sm:$0xf0] }
  0xa2   :  { %1960 = vmatpush.bf16.msra.mxu0 %v2440_v31  ;;  %v3399_v18 = vld [vmem:[%s5855_s1 + $0x788] sm:$0xf]  ;;  %v3696_v19 = vld [vmem:[%s5855_s1 + $0x794] sm:$0xf0]  ;;  %v3272_v22 = vor.u32 %v3664_v16, %v3271_v15  ;;  %v2681_v15 = vld [vmem:[%s5855_s1 + $0x1f8] sm:$0xf0] }
  0xa3   :  { %1974 = vmatpush.bf16.msra.mxu1 %v2568_v35  ;;  %v2999_v23 = vld [vmem:[%s5855_s1 + $0x468] sm:$0xf]  ;;  %v3596_v24 = vld [vmem:[%s5855_s1 + $0x474] sm:$0xf0]  ;;  %v3400_v26 = vor.u32 %v3696_v19, %v3399_v18  ;;  %v3546_v16 = vld [vmem:[%s5855_s1 + $0x2ec] sm:$0xf] }
  0xa4   :  { %1988 = vmatpush.bf16.msra.mxu2 %v2696_v36  ;;  %v3127_v25 = vld [vmem:[%s5855_s1 + $0x568] sm:$0xf]  ;;  %v3628_v27 = vld [vmem:[%s5855_s1 + $0x574] sm:$0xf0]  ;;  %v3000_v32 = vor.u32 %v3596_v24, %v2999_v23  ;;  %v2809_v18 = vld [vmem:[%s5855_s1 + $0x2f8] sm:$0xf0]  ;;  %v2556_v24 = vor.u32 %v3482_v11, %v2553_v12 }
  0xa5   :  { %2002 = vmatpush.bf16.msra.mxu3 %v2824_v40  ;;  %1961 = vmatmul.bf16.vlgmr.msra.gmra.mxu0 %v4005_v58  ;;  %v3255_v28 = vld [vmem:[%s5855_s1 + $0x668] sm:$0xf]  ;;  %v3660_v29 = vld [vmem:[%s5855_s1 + $0x674] sm:$0xf0]  ;;  %v3128_v33 = vor.u32 %v3628_v27, %v3127_v25  ;;  %v3478_v27 = vld [vmem:[%s5855_s1 + $0xcc] sm:$0xf] }
  0xa6   :  { %2009 = vmatpush.bf16.msrb.mxu0 %v3064_v41  ;;  %1975 = vmatmul.bf16.vlgmr.msra.gmra.mxu1 %v4041_v10  ;;  %v3383_v30 = vld [vmem:[%s5855_s1 + $0x768] sm:$0xf]  ;;  %v3692_v31 = vld [vmem:[%s5855_s1 + $0x774] sm:$0xf0]  ;;  %v3256_v34 = vor.u32 %v3660_v29, %v3255_v28  ;;  %v2537_v28 = vld [vmem:[%s5855_s1 + $0xd8] sm:$0xf0] }
  0xa7   :  { %2023 = vmatpush.bf16.msrb.mxu1 %v3192_v42  ;;  %1989 = vmatmul.bf16.vlgmr.msra.gmra.mxu2 %v4019_v1  ;;  %v2983_v35 = vld [vmem:[%s5855_s1 + $0x448] sm:$0xf]  ;;  %v3592_v36 = vld [vmem:[%s5855_s1 + $0x454] sm:$0xf0]  ;;  %v3384_v38 = vor.u32 %v3692_v31, %v3383_v30  ;;  %v3510_v29 = vld [vmem:[%s5855_s1 + $0x1cc] sm:$0xf] }
  0xa8   :  { %2037 = vmatpush.bf16.msrb.mxu2 %v3320_v45  ;;  %2003 = vmatmul.bf16.vlgmr.msra.gmra.mxu3 %v4055_v17  ;;  %v3111_v37 = vld [vmem:[%s5855_s1 + $0x548] sm:$0xf]  ;;  %v3624_v40 = vld [vmem:[%s5855_s1 + $0x554] sm:$0xf0]  ;;  %v2984_v48 = vor.u32 %v3592_v36, %v2983_v35  ;;  %v2665_v31 = vld [vmem:[%s5855_s1 + $0x1d8] sm:$0xf0]  ;;  %v2540_v36 = vor.u32 %v3478_v27, %v2537_v28  ;;  %v5130_v27 = vpop.f32.mrf.mxu1 }
  0xa9   :  { %2051 = vmatpush.bf16.msrb.mxu3 %v3448_v50  ;;  %v3239_v41 = vld [vmem:[%s5855_s1 + $0x648] sm:$0xf]  ;;  %v3656_v42 = vld [vmem:[%s5855_s1 + $0x654] sm:$0xf0]  ;;  %v3112_v49 = vor.u32 %v3624_v40, %v3111_v37  ;;  %v2921_v35 = vld [vmem:[%s5855_s1 + $0x3d8] sm:$0xf0]  ;;  %v2668_v37 = vor.u32 %v3510_v29, %v2665_v31 }
  0xaa   :  { %2010 = vmatpush.bf16.msrb.mxu0 %v3048_v56  ;;  %v3367_v45 = vld [vmem:[%s5855_s1 + $0x748] sm:$0xf]  ;;  %v3688_v46 = vld [vmem:[%s5855_s1 + $0x754] sm:$0xf0]  ;;  %v3240_v50 = vor.u32 %v3656_v42, %v3239_v41  ;;  %v3474_v40 = vld [vmem:[%s5855_s1 + $0xac] sm:$0xf] }
  0xab   :  { %2024 = vmatpush.bf16.msrb.mxu1 %v3176_v57  ;;  %v2967_v51 = vld [vmem:[%s5855_s1 + $0x428] sm:$0xf]  ;;  %v3588_v52 = vld [vmem:[%s5855_s1 + $0x434] sm:$0xf0]  ;;  %v3368_v54 = vor.u32 %v3688_v46, %v3367_v45  ;;  %v2521_v41 = vld [vmem:[%s5855_s1 + $0xb8] sm:$0xf0] }
  0xac   :  { %2038 = vmatpush.bf16.msrb.mxu2 %v3304_v59  ;;  %v3095_v53 = vld [vmem:[%s5855_s1 + $0x528] sm:$0xf]  ;;  %v3620_v55 = vld [vmem:[%s5855_s1 + $0x534] sm:$0xf0]  ;;  %v2968_v61 = vor.u32 %v3588_v52, %v2967_v51  ;;  %v3506_v42 = vld [vmem:[%s5855_s1 + $0x1ac] sm:$0xf]  ;;  %v2524_v52 = vor.u32 %v3474_v40, %v2521_v41 }
  0xad   :  { %2052 = vmatpush.bf16.msrb.mxu3 %v3432_v63  ;;  %v3223_v56 = vld [vmem:[%s5855_s1 + $0x628] sm:$0xf]  ;;  %v3652_v57 = vld [vmem:[%s5855_s1 + $0x634] sm:$0xf0]  ;;  %v3096_v0 = vor.u32 %v3620_v55, %v3095_v53  ;;  %v2649_v46 = vld [vmem:[%s5855_s1 + $0x1b8] sm:$0xf0] }
  0xae   :  { %2011 = vmatpush.bf16.msrb.mxu0 %v3032_v6  ;;  %v3351_v59 = vld [vmem:[%s5855_s1 + $0x728] sm:$0xf]  ;;  %v3684_v60 = vld [vmem:[%s5855_s1 + $0x734] sm:$0xf0]  ;;  %v3224_v2 = vor.u32 %v3652_v57, %v3223_v56  ;;  %v2905_v51 = vld [vmem:[%s5855_s1 + $0x3b8] sm:$0xf0]  ;;  %v2652_v53 = vor.u32 %v3506_v42, %v2649_v46 }
  0xaf   :  { %2025 = vmatpush.bf16.msrb.mxu1 %v3160_v7  ;;  %v2951_v62 = vld [vmem:[%s5855_s1 + $0x408] sm:$0xf]  ;;  %v3584_v63 = vld [vmem:[%s5855_s1 + $0x414] sm:$0xf0]  ;;  %v3352_v6 = vor.u32 %v3684_v60, %v3351_v59  ;;  %v3470_v55 = vld [vmem:[%s5855_s1 + $0x8c] sm:$0xf] }
  0xb0   :  { %2039 = vmatpush.bf16.msrb.mxu2 %v3288_v8  ;;  %v3079_v3 = vld [vmem:[%s5855_s1 + $0x508] sm:$0xf]  ;;  %v3616_v4 = vld [vmem:[%s5855_s1 + $0x514] sm:$0xf0]  ;;  %v2952_v14 = vor.u32 %v3584_v63, %v2951_v62  ;;  %v2505_v56 = vld [vmem:[%s5855_s1 + $0x98] sm:$0xf0] }
  0xb1   :  { %2053 = vmatpush.bf16.msrb.mxu3 %v3416_v13  ;;  %v3207_v5 = vld [vmem:[%s5855_s1 + $0x608] sm:$0xf]  ;;  %v3648_v7 = vld [vmem:[%s5855_s1 + $0x614] sm:$0xf0]  ;;  %v3514_v13 = vld [vmem:[%s5855_s1 + $0x1ec] sm:$0xf]  ;;  %v3080_v19 = vor.u32 %v3616_v4, %v3079_v3  ;;  %v5138_v31 = vpop.f32.mrf.mxu2 }
  0xb2   :  { %2012 = vmatpush.bf16.msrb.mxu0 %v3016_v20  ;;  %v3335_v8 = vld [vmem:[%s5855_s1 + $0x708] sm:$0xf]  ;;  %v3680_v9 = vld [vmem:[%s5855_s1 + $0x714] sm:$0xf0]  ;;  %v3208_v20 = vor.u32 %v3648_v7, %v3207_v5  ;;  %v2684_v25 = vor.u32 %v3514_v13, %v2681_v15  ;;  %v3502_v57 = vld [vmem:[%s5855_s1 + $0x18c] sm:$0xf]  ;;  %v5104_v13 = vpop.f32.mrf.mxu0 }
  0xb3   :  { %2026 = vmatpush.bf16.msrb.mxu1 %v3144_v21  ;;  %v3578_v21 = vld [vmem:[%s5855_s1 + $0x3ec] sm:$0xf]  ;;  %v3336_v23 = vor.u32 %v3680_v9, %v3335_v8  ;;  %v2633_v60 = vld [vmem:[%s5855_s1 + $0x198] sm:$0xf0] }
  0xb4   :  { %2040 = vmatpush.bf16.msrb.mxu2 %v3272_v22  ;;  %v2937_v22 = vld [vmem:[%s5855_s1 + $0x3f8] sm:$0xf0]  ;;  %v3566_v63 = vld [vmem:[%s5855_s1 + $0x38c] sm:$0xf]  ;;  %v2636_v3 = vor.u32 %v3502_v57, %v2633_v60 }
  0xb5   :  { %2054 = vmatpush.bf16.msrb.mxu3 %v3400_v26  ;;  %v2812_v26 = vor.u32 %v3546_v16, %v2809_v18  ;;  %v2940_v30 = vor.u32 %v3578_v21, %v2937_v22  ;;  %v2761_v62 = vld [vmem:[%s5855_s1 + $0x298] sm:$0xf0]  ;;  %v3466_v5 = vld [vmem:[%s5855_s1 + $0x6c] sm:$0xf] }
  0xb6   :  { %2013 = vmatpush.bf16.msrb.mxu0 %v3000_v32  ;;  %v3542_v32 = vld [vmem:[%s5855_s1 + $0x2cc] sm:$0xf]  ;;  %v2617_v9 = vld [vmem:[%s5855_s1 + $0x178] sm:$0xf0] }
  0xb7   :  { %2027 = vmatpush.bf16.msrb.mxu1 %v3128_v33  ;;  %v2793_v33 = vld [vmem:[%s5855_s1 + $0x2d8] sm:$0xf0]  ;;  %v3498_v7 = vld [vmem:[%s5855_s1 + $0x16c] sm:$0xf] }
  0xb8   :  { %2041 = vmatpush.bf16.msrb.mxu2 %v3256_v34  ;;  %v3574_v34 = vld [vmem:[%s5855_s1 + $0x3cc] sm:$0xf]  ;;  %v2745_v12 = vld [vmem:[%s5855_s1 + $0x278] sm:$0xf0]  ;;  %v2620_v18 = vor.u32 %v3498_v7, %v2617_v9 }
  0xb9   :  { %2055 = vmatpush.bf16.msrb.mxu3 %v3384_v38  ;;  %v2796_v38 = vor.u32 %v3542_v32, %v2793_v33  ;;  %v2924_v45 = vor.u32 %v3574_v34, %v2921_v35  ;;  %v3530_v11 = vld [vmem:[%s5855_s1 + $0x26c] sm:$0xf]  ;;  %v2873_v15 = vld [vmem:[%s5855_s1 + $0x378] sm:$0xf0] }
  0xba   :  { %2014 = vmatpush.bf16.msrb.mxu0 %v2984_v48  ;;  %v3538_v48 = vld [vmem:[%s5855_s1 + $0x2ac] sm:$0xf]  ;;  %v2473_v21 = vld [vmem:[%s5855_s1 + $0x58] sm:$0xf0] }
  0xbb   :  { %2028 = vmatpush.bf16.msrb.mxu1 %v3112_v49  ;;  %v2777_v49 = vld [vmem:[%s5855_s1 + $0x2b8] sm:$0xf0]  ;;  %v3494_v22 = vld [vmem:[%s5855_s1 + $0x14c] sm:$0xf] }
  0xbc   :  { %2042 = vmatpush.bf16.msrb.mxu2 %v3240_v50  ;;  %v3570_v50 = vld [vmem:[%s5855_s1 + $0x3ac] sm:$0xf]  ;;  %v2857_v29 = vld [vmem:[%s5855_s1 + $0x358] sm:$0xf0] }
  0xbd   :  { %2056 = vmatpush.bf16.msrb.mxu3 %v3368_v54  ;;  %v2780_v54 = vor.u32 %v3538_v48, %v2777_v49  ;;  %v2908_v59 = vor.u32 %v3570_v50, %v2905_v51  ;;  %v3558_v28 = vld [vmem:[%s5855_s1 + $0x34c] sm:$0xf]  ;;  %v2457_v35 = vld [vmem:[%s5855_s1 + $0x38] sm:$0xf0]  ;;  %v5170_v50 = vpop.f32.mrf.mxu0  ;;  %v5172_v51 = vpop.f32.mrf.mxu3 }
  0xbe   :  { %2015 = vmatpush.bf16.msrb.mxu0 %v2968_v61  ;;  %v3534_v61 = vld [vmem:[%s5855_s1 + $0x28c] sm:$0xf]  ;;  %v2713_v41 = vld [vmem:[%s5855_s1 + $0x238] sm:$0xf0] }
  0xbf   :  { %2029 = vmatpush.bf16.msrb.mxu1 %v3096_v0  ;;  %v2889_v0 = vld [vmem:[%s5855_s1 + $0x398] sm:$0xf0]  ;;  %v2764_v4 = vor.u32 %v3534_v61, %v2761_v62  ;;  %v3458_v34 = vld [vmem:[%s5855_s1 + $0x2c] sm:$0xf] }
  0xc0   :  { %2043 = vmatpush.bf16.msrb.mxu2 %v3224_v2  ;;  %v2508_v2 = vor.u32 %v3470_v55, %v2505_v56  ;;  %v2892_v8 = vor.u32 %v3566_v63, %v2889_v0  ;;  %v3522_v40 = vld [vmem:[%s5855_s1 + $0x22c] sm:$0xf]  ;;  %v2460_v46 = vor.u32 %v3458_v34, %v2457_v35  ;;  %v2441_v49 = vld [vmem:[%s5855_s1 + $0x18] sm:$0xf0] }
  0xc1   :  { %2057 = vmatpush.bf16.msrb.mxu3 %v3352_v6  ;;  %v2489_v6 = vld [vmem:[%s5855_s1 + $0x78] sm:$0xf0]  ;;  %v3554_v42 = vld [vmem:[%s5855_s1 + $0x32c] sm:$0xf] }
  0xc2   :  { %2016 = vmatpush.bf16.msrb.mxu0 %v2952_v14  ;;  %v3562_v14 = vld [vmem:[%s5855_s1 + $0x36c] sm:$0xf]  ;;  %v2492_v16 = vor.u32 %v3466_v5, %v2489_v6  ;;  %v2569_v55 = vld [vmem:[%s5855_s1 + $0x118] sm:$0xf0]  ;;  %v5210_v6 = vpop.f32.mrf.mxu1 }
  0xc3   :  { %2030 = vmatpush.bf16.msrb.mxu1 %v3080_v19  ;;  %v2748_v19 = vor.u32 %v3530_v11, %v2745_v12  ;;  %v3454_v48 = vld [vmem:[%s5855_s1 + $0xc] sm:$0xf]  ;;  %v2825_v61 = vld [vmem:[%s5855_s1 + $0x318] sm:$0xf0] }
  0xc4   :  { %2044 = vmatpush.bf16.msrb.mxu2 %v3208_v20  ;;  %v3462_v20 = vld [vmem:[%s5855_s1 + $0x4c] sm:$0xf]  ;;  %v3065_v63 = vld [vmem:[%s5855_s1 + $0x4f8] sm:$0xf0] }
  0xc5   :  { %2058 = vmatpush.bf16.msrb.mxu3 %v3336_v23  ;;  %2017 = vmatmul.bf16.vlgmr.msrb.gmra.mxu0 %v4227_v39  ;;  %v2876_v23 = vor.u32 %v3562_v14, %v2873_v15  ;;  %v3518_v56 = vld [vmem:[%s5855_s1 + $0x20c] sm:$0xf]  ;;  %v3321_v5 = vld [vmem:[%s5855_s1 + $0x6f8] sm:$0xf0]  ;;  %v5218_v15 = vpop.f32.mrf.mxu2 }
  0xc6   :  { %2065 = vmatpush.bf16.msra.mxu0 %v2556_v24  ;;  %2031 = vmatmul.bf16.vlgmr.msrb.gmra.mxu1 %v4240_v44  ;;  %v2601_v24 = vld [vmem:[%s5855_s1 + $0x158] sm:$0xf0]  ;;  %v3550_v60 = vld [vmem:[%s5855_s1 + $0x30c] sm:$0xf] }
  0xc7   :  { %2079 = vmatpush.bf16.msra.mxu1 %v2684_v25  ;;  %2045 = vmatmul.bf16.vlgmr.msrb.gmra.mxu2 %v4238_v43  ;;  %v3526_v25 = vld [vmem:[%s5855_s1 + $0x24c] sm:$0xf]  ;;  %v2604_v32 = vor.u32 %v3494_v22, %v2601_v24  ;;  %v3449_v11 = vld [vmem:[%s5855_s1 + $0x7f8] sm:$0xf0]  ;;  %v2828_v12 = vor.u32 %v3550_v60, %v2825_v61 }
  0xc8   :  { %2093 = vmatpush.bf16.msra.mxu2 %v2812_v26  ;;  %2059 = vmatmul.bf16.vlgmr.msrb.gmra.mxu3 %v4248_v47  ;;  %v2729_v26 = vld [vmem:[%s5855_s1 + $0x258] sm:$0xf0]  ;;  %v3610_v62 = vld [vmem:[%s5855_s1 + $0x4ec] sm:$0xf] }
  0xc9   :  { %2107 = vmatpush.bf16.msra.mxu3 %v2940_v30  ;;  %v2476_v30 = vor.u32 %v3462_v20, %v2473_v21  ;;  %v2732_v33 = vor.u32 %v3526_v25, %v2729_v26  ;;  %v3642_v0 = vld [vmem:[%s5855_s1 + $0x5ec] sm:$0xf]  ;;  %v3068_v14 = vor.u32 %v3610_v62, %v3065_v63  ;;  %v3049_v20 = vld [vmem:[%s5855_s1 + $0x4d8] sm:$0xf0] }
  0xca   :  { %2066 = vmatpush.bf16.msra.mxu0 %v2540_v36  ;;  %v3490_v36 = vld [vmem:[%s5855_s1 + $0x12c] sm:$0xf]  ;;  %v3305_v25 = vld [vmem:[%s5855_s1 + $0x6d8] sm:$0xf0] }
  0xcb   :  { %2080 = vmatpush.bf16.msra.mxu1 %v2668_v37  ;;  %v2860_v37 = vor.u32 %v3558_v28, %v2857_v29  ;;  %v3706_v9 = vld [vmem:[%s5855_s1 + $0x7ec] sm:$0xf]  ;;  %v3433_v28 = vld [vmem:[%s5855_s1 + $0x7d8] sm:$0xf0] }
  0xcc   :  { %2094 = vmatpush.bf16.msra.mxu2 %v2796_v38  ;;  %v2585_v38 = vld [vmem:[%s5855_s1 + $0x138] sm:$0xf0]  ;;  %v3638_v21 = vld [vmem:[%s5855_s1 + $0x5cc] sm:$0xf]  ;;  %v3452_v22 = vor.u32 %v3706_v9, %v3449_v11 }
  0xcd   :  { %2108 = vmatpush.bf16.msra.mxu3 %v2924_v45  ;;  %v2841_v45 = vld [vmem:[%s5855_s1 + $0x338] sm:$0xf0]  ;;  %v3670_v24 = vld [vmem:[%s5855_s1 + $0x6cc] sm:$0xf] }
  0xce   :  { %2067 = vmatpush.bf16.msra.mxu0 %v2524_v52  ;;  %v2588_v52 = vor.u32 %v3490_v36, %v2585_v38  ;;  %v2844_v57 = vor.u32 %v3554_v42, %v2841_v45  ;;  %v3702_v26 = vld [vmem:[%s5855_s1 + $0x7cc] sm:$0xf]  ;;  %v3308_v34 = vor.u32 %v3670_v24, %v3305_v25  ;;  %v3033_v36 = vld [vmem:[%s5855_s1 + $0x4b8] sm:$0xf0] }
  0xcf   :  { %2081 = vmatpush.bf16.msra.mxu1 %v2652_v53  ;;  %v2716_v53 = vor.u32 %v3522_v40, %v2713_v41  ;;  %v3602_v35 = vld [vmem:[%s5855_s1 + $0x4ac] sm:$0xf]  ;;  %v3436_v38 = vor.u32 %v3702_v26, %v3433_v28  ;;  %v3161_v40 = vld [vmem:[%s5855_s1 + $0x5b8] sm:$0xf0] }
  0xd0   :  { %2095 = vmatpush.bf16.msra.mxu2 %v2780_v54  ;;  %v3486_v54 = vld [vmem:[%s5855_s1 + $0x10c] sm:$0xf]  ;;  %v3289_v42 = vld [vmem:[%s5855_s1 + $0x6b8] sm:$0xf0] }
  0xd1   :  { %2109 = vmatpush.bf16.msra.mxu3 %v2908_v59  ;;  %v2697_v59 = vld [vmem:[%s5855_s1 + $0x218] sm:$0xf0]  ;;  %v2572_v7 = vor.u32 %v3486_v54, %v2569_v55  ;;  %v3666_v41 = vld [vmem:[%s5855_s1 + $0x6ac] sm:$0xf] }
  0xd2   :  { %2068 = vmatpush.bf16.msra.mxu0 %v2508_v2  ;;  %v2444_v2 = vor.u32 %v3454_v48, %v2441_v49  ;;  %v3698_v45 = vld [vmem:[%s5855_s1 + $0x7ac] sm:$0xf]  ;;  %v5276_v48 = vpop.f32.mrf.mxu1  ;;  %v3145_v54 = vld [vmem:[%s5855_s1 + $0x598] sm:$0xf0] }
  0xd3   :  { %2082 = vmatpush.bf16.msra.mxu1 %v2636_v3  ;;  %v3193_v3 = vld [vmem:[%s5855_s1 + $0x5f8] sm:$0xf0]  ;;  %v3662_v55 = vld [vmem:[%s5855_s1 + $0x68c] sm:$0xf] }
  0xd4   :  { %2096 = vmatpush.bf16.msra.mxu2 %v2764_v4  ;;  %v3674_v4 = vld [vmem:[%s5855_s1 + $0x6ec] sm:$0xf]  ;;  %v3401_v60 = vld [vmem:[%s5855_s1 + $0x798] sm:$0xf0] }
  0xd5   :  { %2110 = vmatpush.bf16.msra.mxu3 %v2892_v8  ;;  %v2700_v8 = vor.u32 %v3518_v56, %v2697_v59  ;;  %v3273_v56 = vld [vmem:[%s5855_s1 + $0x698] sm:$0xf0]  ;;  %v3694_v59 = vld [vmem:[%s5855_s1 + $0x78c] sm:$0xf] }
  0xd6   :  { %2069 = vmatpush.bf16.msra.mxu0 %v2492_v16  ;;  %v3196_v16 = vor.u32 %v3642_v0, %v3193_v3  ;;  %v3276_v63 = vor.u32 %v3662_v55, %v3273_v56  ;;  %v3594_v0 = vld [vmem:[%s5855_s1 + $0x46c] sm:$0xf]  ;;  %v3113_v24 = vld [vmem:[%s5855_s1 + $0x558] sm:$0xf0] }
  0xd7   :  { %2083 = vmatpush.bf16.msra.mxu1 %v2620_v18  ;;  %v3324_v18 = vor.u32 %v3674_v4, %v3321_v5  ;;  %v3626_v3 = vld [vmem:[%s5855_s1 + $0x56c] sm:$0xf]  ;;  %v3404_v4 = vor.u32 %v3694_v59, %v3401_v60  ;;  %v3129_v5 = vld [vmem:[%s5855_s1 + $0x578] sm:$0xf0] }
  0xd8   :  { %2097 = vmatpush.bf16.msra.mxu2 %v2748_v19  ;;  %v3606_v19 = vld [vmem:[%s5855_s1 + $0x4cc] sm:$0xf]  ;;  %v3241_v26 = vld [vmem:[%s5855_s1 + $0x658] sm:$0xf0] }
  0xd9   :  { %2111 = vmatpush.bf16.msra.mxu3 %v2876_v23  ;;  %v3177_v23 = vld [vmem:[%s5855_s1 + $0x5d8] sm:$0xf0]  ;;  %v3052_v29 = vor.u32 %v3606_v19, %v3049_v20  ;;  %v3590_v20 = vld [vmem:[%s5855_s1 + $0x44c] sm:$0xf] }
  0xda   :  { %2070 = vmatpush.bf16.msra.mxu0 %v2476_v30  ;;  %v5244_v30 = vpop.f32.mrf.mxu3  ;;  %v3654_v25 = vld [vmem:[%s5855_s1 + $0x64c] sm:$0xf]  ;;  %v5350_v28 = vpop.f32.mrf.mxu1 }
  0xdb   :  { %2084 = vmatpush.bf16.msra.mxu1 %v2604_v32  ;;  %v5246_v32 = vpop.f32.mrf.mxu0  ;;  %v3582_v60 = vld [vmem:[%s5855_s1 + $0x40c] sm:$0xf] }
  0xdc   :  { %2098 = vmatpush.bf16.msra.mxu2 %v2732_v33  ;;  %v3180_v33 = vor.u32 %v3638_v21, %v3177_v23  ;;  %v2985_v21 = vld [vmem:[%s5855_s1 + $0x458] sm:$0xf0] }
  0xdd   :  { %2112 = vmatpush.bf16.msra.mxu3 %v2860_v37  ;;  %v3634_v37 = vld [vmem:[%s5855_s1 + $0x5ac] sm:$0xf] }
  0xde   :  { %2071 = vmatpush.bf16.msra.mxu0 %v2460_v46  ;;  %v3036_v46 = vor.u32 %v3602_v35, %v3033_v36  ;;  %v3164_v49 = vor.u32 %v3634_v37, %v3161_v40  ;;  %v2988_v35 = vor.u32 %v3590_v20, %v2985_v21  ;;  %v3586_v40 = vld [vmem:[%s5855_s1 + $0x42c] sm:$0xf]  ;;  %v339_v21 = vld [vmem:[%s5858_s3 + $0xf0] sm:$0xff] }
  0xdf   :  { %2085 = vmatpush.bf16.msra.mxu1 %v2588_v52  ;;  %v3292_v52 = vor.u32 %v3666_v41, %v3289_v42  ;;  %v2969_v41 = vld [vmem:[%s5855_s1 + $0x438] sm:$0xf0]  ;;  %v3618_v42 = vld [vmem:[%s5855_s1 + $0x52c] sm:$0xf] }
  0xe0   :  { %2099 = vmatpush.bf16.msra.mxu2 %v2716_v53  ;;  %v3598_v53 = vld [vmem:[%s5855_s1 + $0x48c] sm:$0xf] }
  0xe1   :  { %2113 = vmatpush.bf16.msra.mxu3 %v2844_v57  ;;  %v5296_v57 = vpop.f32.mrf.mxu2 }
  0xe2   :  { %2072 = vmatpush.bf16.msra.mxu0 %v2444_v2  ;;  %v3001_v2 = vld [vmem:[%s5855_s1 + $0x478] sm:$0xf0]  ;;  %v5324_v11 = vpop.f32.mrf.mxu3 }
  0xe3   :  { %2086 = vmatpush.bf16.msra.mxu1 %v2572_v7  ;;  %v3658_v7 = vld [vmem:[%s5855_s1 + $0x66c] sm:$0xf]  ;;  %v5322_v9 = vpop.f32.mrf.mxu0 }
  0xe4   :  { %2100 = vmatpush.bf16.msra.mxu2 %v2700_v8  ;;  %v3257_v8 = vld [vmem:[%s5855_s1 + $0x678] sm:$0xf0] }
  0xe5   :  { %2114 = vmatpush.bf16.msra.mxu3 %v2828_v12  ;;  %2073 = vmatmul.bf16.vlgmr.msra.gmra.mxu0 %v4005_v58  ;;  %v3017_v58 = vld [vmem:[%s5855_s1 + $0x498] sm:$0xf0]  ;;  %v3690_v12 = vld [vmem:[%s5855_s1 + $0x76c] sm:$0xf]  ;;  %v3260_v19 = vor.u32 %v3658_v7, %v3257_v8 }
  0xe6   :  { %2121 = vmatpush.bf16.msrb.mxu0 %v3068_v14  ;;  %2087 = vmatmul.bf16.vlgmr.msra.gmra.mxu1 %v4041_v10  ;;  %v3020_v61 = vor.u32 %v3598_v53, %v3017_v58  ;;  %v3385_v14 = vld [vmem:[%s5855_s1 + $0x778] sm:$0xf0]  ;;  %v3682_v53 = vld [vmem:[%s5855_s1 + $0x72c] sm:$0xf] }
  0xe7   :  { %2135 = vmatpush.bf16.msrb.mxu1 %v3196_v16  ;;  %2101 = vmatmul.bf16.vlgmr.msra.gmra.mxu2 %v4019_v1  ;;  %v3417_v1 = vld [vmem:[%s5855_s1 + $0x7b8] sm:$0xf0]  ;;  %v3004_v16 = vor.u32 %v3594_v0, %v3001_v2  ;;  %v3388_v23 = vor.u32 %v3690_v12, %v3385_v14  ;;  %v3646_v2 = vld [vmem:[%s5855_s1 + $0x60c] sm:$0xf] }
  0xe8   :  { %2149 = vmatpush.bf16.msrb.mxu2 %v3324_v18  ;;  %2115 = vmatmul.bf16.vlgmr.msra.gmra.mxu3 %v4055_v17  ;;  %v3630_v17 = vld [vmem:[%s5855_s1 + $0x58c] sm:$0xf]  ;;  %v3420_v10 = vor.u32 %v3698_v45, %v3417_v1  ;;  %v3132_v18 = vor.u32 %v3626_v3, %v3129_v5  ;;  %v3097_v1 = vld [vmem:[%s5855_s1 + $0x538] sm:$0xf0] }
  0xe9   :  { %2163 = vmatpush.bf16.msrb.mxu3 %v3452_v22  ;;  %v3148_v62 = vor.u32 %v3630_v17, %v3145_v54  ;;  %v3622_v22 = vld [vmem:[%s5855_s1 + $0x54c] sm:$0xf]  ;;  %v5363_v36 = vpop.f32.mrf.mxu2  ;;  %v3353_v58 = vld [vmem:[%s5855_s1 + $0x738] sm:$0xf0]  ;;  %v2972_v54 = vor.u32 %v3586_v40, %v2969_v41  ;;  %v3100_v56 = vor.u32 %v3618_v42, %v3097_v1  ;;  %v331_v40 = vld [vmem:[%s5858_s3 + $0xb0] sm:$0xff] }
  0xea   :  { %2122 = vmatpush.bf16.msrb.mxu0 %v3052_v29  ;;  %v3686_v29 = vld [vmem:[%s5855_s1 + $0x74c] sm:$0xf]  ;;  %v3116_v37 = vor.u32 %v3622_v22, %v3113_v24  ;;  %v5391_v55 = vpop.f32.mrf.mxu3  ;;  %v3081_v0 = vld [vmem:[%s5855_s1 + $0x518] sm:$0xf0]  ;;  %v371_v22 = vld [vmem:[%s5858_s3 + $0x1f0] sm:$0xff] }
  0xeb   :  { %2136 = vmatpush.bf16.msrb.mxu1 %v3180_v33  ;;  %v3369_v33 = vld [vmem:[%s5855_s1 + $0x758] sm:$0xf0]  ;;  %v3678_v5 = vld [vmem:[%s5855_s1 + $0x70c] sm:$0xf]  ;;  %v403_v41 = vld [vmem:[%s5858_s3 + $0x2f0] sm:$0xff] }
  0xec   :  { %2150 = vmatpush.bf16.msrb.mxu2 %v3308_v34  ;;  %v5361_v34 = vld [vmem:[%s5857_s2] sm:$0xf]  ;;  %v3372_v45 = vor.u32 %v3686_v29, %v3369_v33  ;;  %v3209_v3 = vld [vmem:[%s5855_s1 + $0x618] sm:$0xf0] }
  0xed   :  { %2164 = vmatpush.bf16.msrb.mxu3 %v3436_v38  ;;  %v3244_v38 = vor.u32 %v3654_v25, %v3241_v26  ;;  %v441_v17 = vperm.slane %v5361_v34, 0  ;;  %v3337_v7 = vld [vmem:[%s5855_s1 + $0x718] sm:$0xf0]  ;;  %v337_v26 = vld [vmem:[%s5858_s3 + $0xe0] sm:$0xff] }
  0xee   :  { %2123 = vmatpush.bf16.msrb.mxu0 %v3036_v46  ;;  %v3650_v46 = vld [vmem:[%s5855_s1 + $0x62c] sm:$0xf]  ;;  %v3340_v20 = vor.u32 %v3678_v5, %v3337_v7  ;;  %v369_v29 = vld [vmem:[%s5858_s3 + $0x1e0] sm:$0xff] }
  0xef   :  { %2137 = vmatpush.bf16.msrb.mxu1 %v3164_v49  ;;  %v3225_v49 = vld [vmem:[%s5855_s1 + $0x638] sm:$0xf0]  ;;  %v1739_v12 = vadd.f32 %v5104_v13, %v441_v17  ;;  %v329_v1 = vld [vmem:[%s5858_s3 + $0xa0] sm:$0xff] }
  0xf0   :  { %2151 = vmatpush.bf16.msrb.mxu2 %v3292_v52  ;;  %v1850_v52 = vpop.f32.mrf.mxu0  ;;  %v3228_v59 = vor.u32 %v3650_v46, %v3225_v49  ;;  %v361_v49 = vld [vmem:[%s5858_s3 + $0x1a0] sm:$0xff] }
  0xf1   :  { %2165 = vmatpush.bf16.msrb.mxu3 %v3420_v10  ;;  %v442_v10 = vperm.slane %v5361_v34, 1  ;;  %v321_v7 = vld [vmem:[%s5858_s3 + $0x60] sm:$0xff] }
  0xf2   :  { %2124 = vmatpush.bf16.msrb.mxu0 %v3020_v61  ;;  %v2953_v61 = vld [vmem:[%s5855_s1 + $0x418] sm:$0xf0]  ;;  %v1892_v24 = vpop.f32.mrf.mxu3 }
  0xf3   :  { %2138 = vmatpush.bf16.msrb.mxu1 %v3148_v62  ;;  %v3614_v62 = vld [vmem:[%s5855_s1 + $0x50c] sm:$0xf]  ;;  %v2956_v8 = vor.u32 %v3582_v60, %v2953_v61  ;;  %v397_v60 = vld [vmem:[%s5858_s3 + $0x2c0] sm:$0xff] }
  0xf4   :  { %2152 = vmatpush.bf16.msrb.mxu2 %v3276_v63  ;;  %v3356_v63 = vor.u32 %v3682_v53, %v3353_v58  ;;  %v3084_v14 = vor.u32 %v3614_v62, %v3081_v0  ;;  %v401_v53 = vld [vmem:[%s5858_s3 + $0x2e0] sm:$0xff]  ;;  %v323_v0 = vld [vmem:[%s5858_s3 + $0x70] sm:$0xff] }
  0xf5   :  { %2166 = vmatpush.bf16.msrb.mxu3 %v3404_v4  ;;  %v1864_v4 = vpop.f32.mrf.mxu1  ;;  %v357_v62 = vld [vmem:[%s5858_s3 + $0x180] sm:$0xff] }
  0xf6   :  { %2125 = vmatpush.bf16.msrb.mxu0 %v3004_v16  ;;  %v3212_v16 = vor.u32 %v3646_v2, %v3209_v3  ;;  %v395_v2 = vld [vmem:[%s5858_s3 + $0x2b0] sm:$0xff] }
  0xf7   :  { %2139 = vmatpush.bf16.msrb.mxu1 %v3132_v18  ;;  %v1878_v18 = vpop.f32.mrf.mxu2 }
  0xf8   :  { %2153 = vmatpush.bf16.msrb.mxu2 %v3260_v19  ;;  %v1851_v19 = vadd.f32 %v1850_v52, %v442_v10  ;;  %v1852_v13 = vpop.f32.mrf.mxu0 }
  0xf9   :  { %2167 = vmatpush.bf16.msrb.mxu3 %v3388_v23  ;;  %v1753_v23 = vadd.f32 %v5130_v27, %v1739_v12  ;;  %v335_v27 = vld [vmem:[%s5858_s3 + $0xd0] sm:$0xff] }
  0xfa   :  { %2126 = vmatpush.bf16.msrb.mxu0 %v2988_v35  ;;  %v1865_v25 = vadd.f32 %v1864_v4, %v1851_v19 }
  0xfb   :  { %2140 = vmatpush.bf16.msrb.mxu1 %v3116_v37  ;;  %v1767_v33 = vadd.f32 %v5138_v31, %v1753_v23  ;;  %v365_v31 = vld [vmem:[%s5858_s3 + $0x1c0] sm:$0xff] }
  0xfc   :  { %2154 = vmatpush.bf16.msrb.mxu2 %v3244_v38  ;;  %v1879_v37 = vadd.f32 %v1878_v18, %v1865_v25  ;;  %v1853_v38 = vadd.f32 %v1852_v13, %v442_v10  ;;  %v391_v18 = vld [vmem:[%s5858_s3 + $0x290] sm:$0xff]  ;;  %v317_v23 = vld [vmem:[%s5858_s3 + $0x40] sm:$0xff] }
  0xfd   :  { %2168 = vmatpush.bf16.msrb.mxu3 %v3372_v45  ;;  %v1866_v35 = vpop.f32.mrf.mxu1  ;;  %v1781_v42 = vadd.f32 %v5172_v51, %v1767_v33  ;;  %v1894_v51 = vpop.f32.mrf.mxu3  ;;  %v389_v13 = vld [vmem:[%s5858_s3 + $0x280] sm:$0xff] }
  0xfe   :  { %2127 = vmatpush.bf16.msrb.mxu0 %v2972_v54  ;;  %v1893_v45 = vadd.f32 %v1892_v24, %v1879_v37  ;;  %v1867_v58 = vadd.f32 %v1866_v35, %v1853_v38  ;;  %v359_v54 = vld [vmem:[%s5858_s3 + $0x190] sm:$0xff]  ;;  %v349_v24 = vld [vmem:[%s5858_s3 + $0x140] sm:$0xff] }
  0xff   :  { %2141 = vmatpush.bf16.msrb.mxu1 %v3100_v56  ;;  %v1795_v10 = vadd.f32 %v5246_v32, %v1781_v42  ;;  %v313_v35 = vld [vmem:[%s5858_s3 + $0x20] sm:$0xff]  ;;  %v383_v38 = vld [vmem:[%s5858_s3 + $0x250] sm:$0xff] }
 0x100   :  { %2155 = vmatpush.bf16.msrb.mxu2 %v3228_v59  ;;  %v325_v59 = vld [vmem:[%s5858_s3 + $0x80] sm:$0xff] }
 0x101   :  { %2169 = vmatpush.bf16.msrb.mxu3 %v3356_v63  ;;  %v1809_v3 = vadd.f32 %v5276_v48, %v1795_v10  ;;  %v353_v48 = vld [vmem:[%s5858_s3 + $0x160] sm:$0xff]  ;;  %v370_v10 = vld [vmem:[%s5858_s3 + $0x1e8] sm:$0xff] }
 0x102   :  { %2128 = vmatpush.bf16.msrb.mxu0 %v2956_v8  ;;  %v1906_v52 = vpop.f32.mrf.mxu0  ;;  %v393_v8 = vld [vmem:[%s5858_s3 + $0x2a0] sm:$0xff] }
 0x103   :  { %2142 = vmatpush.bf16.msrb.mxu1 %v3084_v14  ;;  %v1907_v56 = vadd.f32 %v1906_v52, %v1893_v45  ;;  %v1823_v19 = vadd.f32 %v5296_v57, %v1809_v3  ;;  %v385_v37 = vld [vmem:[%s5858_s3 + $0x260] sm:$0xff]  ;;  %v364_v3 = vld [vmem:[%s5858_s3 + $0x1b8] sm:$0xff] }
 0x104   :  { %2156 = vmatpush.bf16.msrb.mxu2 %v3212_v16  ;;  %v319_v16 = vld [vmem:[%s5858_s3 + $0x50] sm:$0xff]  ;;  %v309_v45 = vld [vmem:[%s5858_s3] sm:$0xff] }
 0x105   :  { %2170 = vmatpush.bf16.msrb.mxu3 %v3340_v20  ;;  %2129 = vmatmul.bf16.vlgmr.msrb.gmra.mxu0 %v4227_v39  ;;  %v367_v39 = vld [vmem:[%s5858_s3 + $0x1d0] sm:$0xff]  ;;  %v1920_v32 = vpop.f32.mrf.mxu1 }
 0x106   :  { %2206 = vmatpush.msra.mxu0 %v339_v21  ;;  %2143 = vmatmul.bf16.vlgmr.msrb.gmra.mxu1 %v4240_v44  ;;  %v1741_v44 = vadd.f32 %v5170_v50, %v441_v17  ;;  %v363_v50 = vld [vmem:[%s5858_s3 + $0x1b0] sm:$0xff]  ;;  %v1921_v5 = vadd.f32 %v1920_v32, %v1907_v56  ;;  %v336_v56 = vld [vmem:[%s5858_s3 + $0xd8] sm:$0xff]  ;;  %v334_v32 = vld [vmem:[%s5858_s3 + $0xc8] sm:$0xff] }
 0x107   :  { %2229 = vmatpush.msra.mxu1 %v371_v22  ;;  %2157 = vmatmul.bf16.vlgmr.msrb.gmra.mxu2 %v4238_v43  ;;  %v333_v43 = vld [vmem:[%s5858_s3 + $0xc0] sm:$0xff]  ;;  %v327_v17 = vld [vmem:[%s5858_s3 + $0x90] sm:$0xff] }
 0x108   :  { %2171 = vmatmul.bf16.vlgmr.msrb.gmra.mxu3 %v4248_v47  ;;  %2207 = vmatpush.msra.mxu0 %v337_v26  ;;  %v1880_v47 = vpop.f32.mrf.mxu2  ;;  %v1755_v46 = vadd.f32 %v5210_v6, %v1741_v44  ;;  %v399_v6 = vld [vmem:[%s5858_s3 + $0x2d0] sm:$0xff]  ;;  %v345_v44 = vld [vmem:[%s5858_s3 + $0x120] sm:$0xff] }
 0x109   :  { %2230 = vmatpush.msra.mxu1 %v369_v29  ;;  %2252 = vmatpush.msra.mxu2 %v403_v41  ;;  %v1881_v63 = vadd.f32 %v1880_v47, %v1867_v58  ;;  %v351_v21 = vld [vmem:[%s5858_s3 + $0x150] sm:$0xff] }
 0x10a   :  { %2208 = vmatpush.msra.mxu0 %v335_v27  ;;  %v1769_v61 = vadd.f32 %v5218_v15, %v1755_v46  ;;  %v355_v15 = vld [vmem:[%s5858_s3 + $0x170] sm:$0xff]  ;;  %v1837_v27 = vadd.f32 %v5324_v11, %v1823_v19  ;;  %v341_v46 = vld [vmem:[%s5858_s3 + $0x100] sm:$0xff]  ;;  %v358_v19 = vld [vmem:[%s5858_s3 + $0x188] sm:$0xff] }
 0x10b   :  { %2231 = vmatpush.msra.mxu1 %v367_v39  ;;  %2253 = vmatpush.msra.mxu2 %v401_v53  ;;  %v1895_v14 = vadd.f32 %v1894_v51, %v1881_v63  ;;  %v1948_v20 = vpop.f32.mrf.mxu3  ;;  %v315_v26 = vld [vmem:[%s5858_s3 + $0x30] sm:$0xff]  ;;  %v372_v53 = vld [vmem:[%s5858_s3 + $0x1f8] sm:$0xff]  ;;  %v366_v63 = vld [vmem:[%s5858_s3 + $0x1c8] sm:$0xff] }
 0x10c   :  { %2209 = vmatpush.msra.mxu0 %v333_v43  ;;  %v1783_v12 = vadd.f32 %v5244_v30, %v1769_v61  ;;  %v1908_v30 = vpop.f32.mrf.mxu0  ;;  %v387_v29 = vld [vmem:[%s5858_s3 + $0x270] sm:$0xff]  ;;  %vm2177_vm0 = vcmp.gt.f32.partialorder %v1837_v27, 0.0 }
 0x10d   :  { %2232 = vmatpush.msra.mxu1 %v365_v31  ;;  %2254 = vmatpush.msra.mxu2 %v399_v6  ;;  %v1909_v25 = vadd.f32 %v1908_v30, %v1895_v14  ;;  %v1922_v33 = vpop.f32.mrf.mxu1  ;;  %v311_v47 = vld [vmem:[%s5858_s3 + $0x10] sm:$0xff]  ;;  %v360_v14 = vld [vmem:[%s5858_s3 + $0x198] sm:$0xff] }
 0x10e   :  { %2210 = vmatpush.msra.mxu0 %v331_v40  ;;  %v1797_v57 = vadd.f32 %v5322_v9, %v1783_v12  ;;  %v347_v9 = vld [vmem:[%s5858_s3 + $0x130] sm:$0xff]  ;;  %v2185_v40 = vmul.f32 0.2, %v1837_v27  ;;  %v328_v12 = vld [vmem:[%s5858_s3 + $0x98] sm:$0xff] }
 0x10f   :  { %2233 = vmatpush.msra.mxu1 %v363_v50  ;;  %2255 = vmatpush.msra.mxu2 %v397_v60  ;;  %v1923_v31 = vadd.f32 %v1922_v33, %v1909_v25  ;;  %v343_v41 = vld [vmem:[%s5858_s3 + $0x110] sm:$0xff]  ;;  %v324_v30 = vld [vmem:[%s5858_s3 + $0x78] sm:$0xff]  ;;  %v354_v25 = vld [vmem:[%s5858_s3 + $0x168] sm:$0xff] }
 0x110   :  { %2211 = vmatpush.msra.mxu0 %v329_v1  ;;  %v1934_v4 = vpop.f32.mrf.mxu2  ;;  %v1811_v43 = vadd.f32 %v5350_v28, %v1797_v57  ;;  %v381_v1 = vld [vmem:[%s5858_s3 + $0x240] sm:$0xff]  ;;  %v5573_v52 = vsel %vm2177_vm0, %v1837_v27, %v2185_v40  ;;  %v379_v58 = vld [vmem:[%s5858_s3 + $0x230] sm:$0xff]  ;;  %v352_v27 = vld [vmem:[%s5858_s3 + $0x158] sm:$0xff] }
 0x111   :  { %2234 = vmatpush.msra.mxu1 %v361_v49  ;;  %2256 = vmatpush.msra.mxu2 %v395_v2  ;;  %v1935_v22 = vadd.f32 %v1934_v4, %v1921_v5  ;;  %v340_v49 = vld [vmem:[%s5858_s3 + $0xf8] sm:$0xff]  ;;  %v375_v61 = vld [vmem:[%s5858_s3 + $0x210] sm:$0xff]  ;;  %v330_v5 = vld [vmem:[%s5858_s3 + $0xa8] sm:$0xff] }
 0x112   :  { %2212 = vmatpush.msra.mxu0 %v327_v17  ;;  %v1825_v28 = vadd.f32 %v5363_v36, %v1811_v43  ;;  %v388_v40 = vld [vmem:[%s5858_s3 + $0x278] sm:$0xff] }
 0x113   :  { %2235 = vmatpush.msra.mxu1 %v359_v54  ;;  %2257 = vmatpush.msra.mxu2 %v393_v8  ;;  %v1949_v39 = vadd.f32 %v1948_v20, %v1935_v22  ;;  %v1950_v36 = vpop.f32.mrf.mxu3  ;;  %v377_v54 = vld [vmem:[%s5858_s3 + $0x220] sm:$0xff]  ;;  %v362_v8 = vld [vmem:[%s5858_s3 + $0x1a8] sm:$0xff] }
 0x114   :  { %2213 = vmatpush.msra.mxu0 %v325_v59  ;;  %v1839_v51 = vadd.f32 %v5391_v55, %v1825_v28  ;;  %v338_v55 = vld [vmem:[%s5858_s3 + $0xe8] sm:$0xff]  ;;  %v368_v59 = vld [vmem:[%s5858_s3 + $0x1d8] sm:$0xff] }
 0x115   :  { %2236 = vmatpush.msra.mxu1 %v357_v62  ;;  %2258 = vmatpush.msra.mxu2 %v391_v18  ;;  %v2186_v42 = vmul.f32 0.2, %v1949_v39  ;;  %vm2178_vm1 = vcmp.gt.f32.partialorder %v1949_v39, 0.0  ;;  %v400_v18 = vld [vmem:[%s5858_s3 + $0x2d8] sm:$0xff]  ;;  %v398_v20 = vld [vmem:[%s5858_s3 + $0x2c8] sm:$0xff] }
 0x116   :  { %2214 = vmatpush.msra.mxu0 %v323_v0  ;;  %v2189_v60 = vmul.f32 0.2, %v1839_v51  ;;  %vm2181_vm2 = vcmp.gt.f32.partialorder %v1839_v51, 0.0  ;;  %v332_v0 = vld [vmem:[%s5858_s3 + $0xb8] sm:$0xff]  ;;  %v346_v28 = vld [vmem:[%s5858_s3 + $0x128] sm:$0xff] }
 0x117   :  { %2237 = vmatpush.msra.mxu1 %v355_v15  ;;  %2259 = vmatpush.msra.mxu2 %v389_v13  ;;  %v5582_v6 = vsel %vm2178_vm1, %v1949_v39, %v2186_v42  ;;  %v373_v15 = vld [vmem:[%s5858_s3 + $0x200] sm:$0xff]  ;;  %v443_v13 = vperm.slane %v5361_v34, 2  ;;  %v392_v39 = vld [vmem:[%s5858_s3 + $0x298] sm:$0xff] }
 0x118   :  { %2215 = vmatpush.msra.mxu0 %v321_v7  ;;  %v1936_v11 = vpop.f32.mrf.mxu2  ;;  %v5612_v2 = vsel %vm2181_vm2, %v1839_v51, %v2189_v60  ;;  %v404_v7 = vld [vmem:[%s5858_s3 + $0x2f8] sm:$0xff]  ;;  %v310_v51 = vld [vmem:[%s5858_s3 + $0x8] sm:$0xff] }
 0x119   :  { %2238 = vmatpush.msra.mxu1 %v353_v48  ;;  %2260 = vmatpush.msra.mxu2 %v387_v29  ;;  %v1937_v50 = vadd.f32 %v1936_v11, %v1923_v31  ;;  %v402_v48 = vld [vmem:[%s5858_s3 + $0x2e8] sm:$0xff]  ;;  %v312_v42 = vld [vmem:[%s5858_s3 + $0x18] sm:$0xff] }
 0x11a   :  { %2216 = vmatpush.msra.mxu0 %v319_v16  ;;  %v326_v16 = vld [vmem:[%s5858_s3 + $0x88] sm:$0xff] }
 0x11b   :  { %2239 = vmatpush.msra.mxu1 %v351_v21  ;;  %2261 = vmatpush.msra.mxu2 %v385_v37  ;;  %v1951_v17 = vadd.f32 %v1950_v36, %v1937_v50  ;;  %v356_v21 = vld [vmem:[%s5858_s3 + $0x178] sm:$0xff]  ;;  %v394_v29 = vld [vmem:[%s5858_s3 + $0x2a8] sm:$0xff] }
 0x11c   :  { %2217 = vmatpush.msra.mxu0 %v317_v23  ;;  %v322_v23 = vld [vmem:[%s5858_s3 + $0x68] sm:$0xff]  ;;  %v316_v37 = vld [vmem:[%s5858_s3 + $0x38] sm:$0xff] }
 0x11d   :  { %2240 = vmatpush.msra.mxu1 %v349_v24  ;;  %2262 = vmatpush.msra.mxu2 %v383_v38  ;;  %v2190_v62 = vmul.f32 0.2, %v1951_v17  ;;  %vm2182_vm3 = vcmp.gt.f32.partialorder %v1951_v17, 0.0  ;;  %v396_v24 = vld [vmem:[%s5858_s3 + $0x2b8] sm:$0xff]  ;;  %v390_v11 = vld [vmem:[%s5858_s3 + $0x288] sm:$0xff] }
 0x11e   :  { %2218 = vmatpush.msra.mxu0 %v315_v26  ;;  %v320_v26 = vld [vmem:[%s5858_s3 + $0x58] sm:$0xff]  ;;  %v314_v38 = vld [vmem:[%s5858_s3 + $0x28] sm:$0xff] }
 0x11f   :  { %2241 = vmatpush.msra.mxu1 %v347_v9  ;;  %2263 = vmatpush.msra.mxu2 %v381_v1  ;;  %v5621_v4 = vsel %vm2182_vm3, %v1951_v17, %v2190_v62  ;;  %v318_v9 = vld [vmem:[%s5858_s3 + $0x48] sm:$0xff]  ;;  %v435_v1 = vld [vmem:[%s5858_s3 + $0x3f0] sm:$0xff]  ;;  %v344_v36 = vld [vmem:[%s5858_s3 + $0x118] sm:$0xff] }
 0x120   :  { %2219 = vmatpush.msra.mxu0 %v313_v35  ;;  %v350_v35 = vld [vmem:[%s5858_s3 + $0x148] sm:$0xff]  ;;  %2275 = vmatpush.msra.mxu3 %v435_v1  ;;  %v429_v62 = vld [vmem:[%s5858_s3 + $0x3c0] sm:$0xff] }
 0x121   :  { %2242 = vmatpush.msra.mxu1 %v345_v44  ;;  %2264 = vmatpush.msra.mxu2 %v379_v58  ;;  %v348_v44 = vld [vmem:[%s5858_s3 + $0x138] sm:$0xff]  ;;  %v342_v17 = vld [vmem:[%s5858_s3 + $0x108] sm:$0xff] }
 0x122   :  { %2220 = vmatpush.msra.mxu0 %v311_v47  ;;  %v1962_v22 = vpop.f32.mrf.mxu0 }
 0x123   :  { %2243 = vmatpush.msra.mxu1 %v343_v41  ;;  %2265 = vmatpush.msra.mxu2 %v377_v54  ;;  %v1976_v57 = vpop.f32.mrf.mxu1  ;;  %v1963_v33 = vadd.f32 %v1962_v22, %v443_v13 }
 0x124   :  { %2221 = vmatpush.msra.mxu0 %v309_v45  ;;  %v386_v45 = vld [vmem:[%s5858_s3 + $0x268] sm:$0xff] }
 0x125   :  { %2244 = vmatpush.msra.mxu1 %v341_v46  ;;  %2222 = vmatmul.f32.vlgmr.msra.gmra.mxu0 %v5573_v52  ;;  %v1977_v47 = vadd.f32 %v1976_v57, %v1963_v33  ;;  %v433_v46 = vld [vmem:[%s5858_s3 + $0x3e0] sm:$0xff]  ;;  %v411_v33 = vld [vmem:[%s5858_s3 + $0x330] sm:$0xff] }
 0x126   :  { %2245 = vmatmul.f32.vlgmr.msra.gmra.mxu1 %v5582_v6  ;;  %2298 = vmatpush.msrb.mxu0 %v340_v49 }
 0x127   :  { %2321 = vmatpush.msrb.mxu1 %v372_v53  ;;  %2266 = vmatpush.msra.mxu2 %v375_v61  ;;  %v384_v53 = vld [vmem:[%s5858_s3 + $0x258] sm:$0xff] }
 0x128   :  { %2299 = vmatpush.msrb.mxu0 %v338_v55  ;;  %v382_v55 = vld [vmem:[%s5858_s3 + $0x248] sm:$0xff]  ;;  %2276 = vmatpush.msra.mxu3 %v433_v46 }
 0x129   :  { %2322 = vmatpush.msrb.mxu1 %v370_v10  ;;  %2267 = vmatpush.msra.mxu2 %v373_v15  ;;  %v431_v10 = vld [vmem:[%s5858_s3 + $0x3d0] sm:$0xff]  ;;  %v418_v46 = vld [vmem:[%s5858_s3 + $0x368] sm:$0xff] }
 0x12a   :  { %2300 = vmatpush.msrb.mxu0 %v336_v56  ;;  %v1990_v43 = vpop.f32.mrf.mxu2  ;;  %v1964_v41 = vpop.f32.mrf.mxu0  ;;  %2277 = vmatpush.msra.mxu3 %v431_v10  ;;  %v412_v10 = vld [vmem:[%s5858_s3 + $0x338] sm:$0xff] }
 0x12b   :  { %2323 = vmatpush.msrb.mxu1 %v368_v59  ;;  %2344 = vmatpush.msrb.mxu2 %v404_v7  ;;  %v2004_v31 = vpop.f32.mrf.mxu3  ;;  %v1978_v50 = vpop.f32.mrf.mxu1  ;;  %v1991_v49 = vadd.f32 %v1990_v43, %v1977_v47  ;;  %v1965_v58 = vadd.f32 %v1964_v41, %v443_v13  ;;  %v380_v59 = vld [vmem:[%s5858_s3 + $0x238] sm:$0xff]  ;;  %v374_v7 = vld [vmem:[%s5858_s3 + $0x208] sm:$0xff]  ;;  %v415_v13 = vld [vmem:[%s5858_s3 + $0x350] sm:$0xff] }
 0x12c   :  { %2301 = vmatpush.msrb.mxu0 %v334_v32  ;;  %v378_v32 = vld [vmem:[%s5858_s3 + $0x228] sm:$0xff]  ;;  %2278 = vmatpush.msra.mxu3 %v429_v62  ;;  %v432_v47 = vld [vmem:[%s5858_s3 + $0x3d8] sm:$0xff] }
 0x12d   :  { %2324 = vmatpush.msrb.mxu1 %v366_v63  ;;  %2225 = vmatmul.f32.gmra.mxu0 %v5612_v2  ;;  %v2005_v54 = vadd.f32 %v2004_v31, %v1991_v49  ;;  %v1979_v60 = vadd.f32 %v1978_v50, %v1965_v58  ;;  %v427_v63 = vld [vmem:[%s5858_s3 + $0x3b0] sm:$0xff]  ;;  %v434_v31 = vld [vmem:[%s5858_s3 + $0x3e8] sm:$0xff]  ;;  %v424_v41 = vld [vmem:[%s5858_s3 + $0x398] sm:$0xff] }
 0x12e   :  { %2248 = vmatmul.f32.gmra.mxu1 %v5621_v4  ;;  %2302 = vmatpush.msrb.mxu0 %v332_v0  ;;  %v422_v50 = vld [vmem:[%s5858_s3 + $0x388] sm:$0xff] }
 0x12f   :  { %2325 = vmatpush.msrb.mxu1 %v364_v3  ;;  %2345 = vmatpush.msrb.mxu2 %v402_v48  ;;  %v376_v3 = vld [vmem:[%s5858_s3 + $0x218] sm:$0xff] }
 0x130   :  { %2303 = vmatpush.msrb.mxu0 %v330_v5  ;;  %v425_v5 = vld [vmem:[%s5858_s3 + $0x3a0] sm:$0xff]  ;;  %2279 = vmatpush.msra.mxu3 %v427_v63 }
 0x131   :  { %2326 = vmatpush.msrb.mxu1 %v362_v8  ;;  %2346 = vmatpush.msrb.mxu2 %v400_v18 }
 0x132   :  { %2304 = vmatpush.msrb.mxu0 %v328_v12  ;;  %v1992_v56 = vpop.f32.mrf.mxu2  ;;  %v423_v12 = vld [vmem:[%s5858_s3 + $0x390] sm:$0xff]  ;;  %2280 = vmatpush.msra.mxu3 %v425_v5 }
 0x133   :  { %2327 = vmatpush.msrb.mxu1 %v360_v14  ;;  %2347 = vmatpush.msrb.mxu2 %v398_v20  ;;  %v2006_v61 = vpop.f32.mrf.mxu3  ;;  %v1993_v15 = vadd.f32 %v1992_v56, %v1979_v60  ;;  %v419_v20 = vld [vmem:[%s5858_s3 + $0x370] sm:$0xff] }
 0x134   :  { %2305 = vmatpush.msrb.mxu0 %v326_v16  ;;  %2281 = vmatpush.msra.mxu3 %v423_v12  ;;  %v421_v16 = vld [vmem:[%s5858_s3 + $0x380] sm:$0xff] }
 0x135   :  { %2328 = vmatpush.msrb.mxu1 %v358_v19  ;;  %2348 = vmatpush.msrb.mxu2 %v396_v24  ;;  %v2007_v48 = vadd.f32 %v2006_v61, %v1993_v15  ;;  %v408_v61 = vld [vmem:[%s5858_s3 + $0x318] sm:$0xff] }
 0x136   :  { %2306 = vmatpush.msrb.mxu0 %v324_v30  ;;  %2282 = vmatpush.msra.mxu3 %v421_v16 }
 0x137   :  { %2329 = vmatpush.msrb.mxu1 %v356_v21  ;;  %2349 = vmatpush.msrb.mxu2 %v394_v29 }
 0x138   :  { %2307 = vmatpush.msrb.mxu0 %v322_v23  ;;  %2283 = vmatpush.msra.mxu3 %v419_v20 }
 0x139   :  { %2330 = vmatpush.msrb.mxu1 %v354_v25  ;;  %2350 = vmatpush.msrb.mxu2 %v392_v39  ;;  %v413_v25 = vld [vmem:[%s5858_s3 + $0x340] sm:$0xff] }
 0x13a   :  { %2308 = vmatpush.msrb.mxu0 %v320_v26  ;;  %v409_v39 = vld [vmem:[%s5858_s3 + $0x320] sm:$0xff] }
 0x13b   :  { %2331 = vmatpush.msrb.mxu1 %v352_v27  ;;  %2351 = vmatpush.msrb.mxu2 %v390_v11  ;;  %v405_v11 = vld [vmem:[%s5858_s3 + $0x300] sm:$0xff] }
 0x13c   :  { %2309 = vmatpush.msrb.mxu0 %v318_v9 }
 0x13d   :  { %2332 = vmatpush.msrb.mxu1 %v350_v35  ;;  %2352 = vmatpush.msrb.mxu2 %v388_v40  ;;  %v428_v40 = vld [vmem:[%s5858_s3 + $0x3b8] sm:$0xff] }
 0x13e   :  { %2310 = vmatpush.msrb.mxu0 %v316_v37  ;;  %v407_v37 = vld [vmem:[%s5858_s3 + $0x310] sm:$0xff] }
 0x13f   :  { %2333 = vmatpush.msrb.mxu1 %v348_v44  ;;  %2353 = vmatpush.msrb.mxu2 %v386_v45  ;;  %v436_v44 = vld [vmem:[%s5858_s3 + $0x3f8] sm:$0xff]  ;;  %v444_v45 = vperm.slane %v5361_v34, 3  ;;  %v414_v34 = vld [vmem:[%s5858_s3 + $0x348] sm:$0xff] }
 0x140   :  { %2311 = vmatpush.msrb.mxu0 %v314_v38  ;;  %v430_v38 = vld [vmem:[%s5858_s3 + $0x3c8] sm:$0xff] }
 0x141   :  { %2334 = vmatpush.msrb.mxu1 %v346_v28  ;;  %2354 = vmatpush.msrb.mxu2 %v384_v53  ;;  %v426_v28 = vld [vmem:[%s5858_s3 + $0x3a8] sm:$0xff] }
 0x142   :  { %2312 = vmatpush.msrb.mxu0 %v312_v42 }
 0x143   :  { %2335 = vmatpush.msrb.mxu1 %v344_v36  ;;  %2355 = vmatpush.msrb.mxu2 %v382_v55  ;;  %v420_v36 = vld [vmem:[%s5858_s3 + $0x378] sm:$0xff] }
 0x144   :  { %2313 = vmatpush.msrb.mxu0 %v310_v51  ;;  %v416_v51 = vld [vmem:[%s5858_s3 + $0x358] sm:$0xff] }
 0x145   :  { %2336 = vmatpush.msrb.mxu1 %v342_v17  ;;  %2314 = vmatmul.f32.vlgmr.msrb.gmra.mxu0 %v5573_v52  ;;  %v2018_v52 = vpop.f32.mrf.mxu0 }
 0x146   :  { %2337 = vmatmul.f32.vlgmr.msrb.gmra.mxu1 %v5582_v6  ;;  %2356 = vmatpush.msrb.mxu2 %v380_v59  ;;  %v2019_v0 = vadd.f32 %v2018_v52, %v2005_v54  ;;  %v2032_v6 = vpop.f32.mrf.mxu1  ;;  %v410_v54 = vld [vmem:[%s5858_s3 + $0x328] sm:$0xff] }
 0x148   :  { %2357 = vmatpush.msrb.mxu2 %v378_v32  ;;  %v2033_v8 = vadd.f32 %v2032_v6, %v2019_v0  ;;  %v406_v6 = vld [vmem:[%s5858_s3 + $0x308] sm:$0xff] }
 0x14a   :  { %2358 = vmatpush.msrb.mxu2 %v376_v3  ;;  %v2046_v14 = vpop.f32.mrf.mxu2 }
 0x14b   :  { %v2047_v18 = vadd.f32 %v2046_v14, %v2033_v8  ;;  %v2060_v30 = vpop.f32.mrf.mxu3 }
 0x14c   :  { %2359 = vmatpush.msrb.mxu2 %v374_v7 }
 0x14d   :  { %2317 = vmatmul.f32.gmra.mxu0 %v5612_v2  ;;  %v2020_v19 = vpop.f32.mrf.mxu0  ;;  %v2061_v21 = vadd.f32 %v2060_v30, %v2047_v18 }
 0x14e   :  { %2340 = vmatmul.f32.gmra.mxu1 %v5621_v4  ;;  %v2021_v2 = vadd.f32 %v2020_v19, %v2007_v48  ;;  %v417_v4 = vld [vmem:[%s5858_s3 + $0x360] sm:$0xff]  ;;  %v2034_v22 = vpop.f32.mrf.mxu1 }
 0x14f   :  { %vm2179_vm4 = vcmp.gt.f32.partialorder %v2061_v21, 0.0  ;;  %v2187_v23 = vmul.f32 0.2, %v2061_v21  ;;  %2284 = vmatpush.msra.mxu3 %v417_v4 }
 0x150   :  { %v2035_v57 = vadd.f32 %v2034_v22, %v2021_v2 }
 0x151   :  { %v2195_v24 = vsel %vm2179_vm4, %v2061_v21, %v2187_v23  ;;  %2285 = vmatpush.msra.mxu3 %v415_v13 }
 0x152   :  { %v2048_v26 = vpop.f32.mrf.mxu2  ;;  %2268 = vmatmul.f32.vlgmr.msra.gmra.mxu2 %v2195_v24 }
 0x153   :  { %v2049_v29 = vadd.f32 %v2048_v26, %v2035_v57  ;;  %v2062_v27 = vpop.f32.mrf.mxu3  ;;  %2286 = vmatpush.msra.mxu3 %v413_v25 }
 0x155   :  { %v2063_v9 = vadd.f32 %v2062_v27, %v2049_v29  ;;  %2287 = vmatpush.msra.mxu3 %v411_v33  ;;  %v437_v27 = vld [vmem:[%s5859_s4] sm:$0x3] }
 0x157   :  { %vm2183_vm5 = vcmp.gt.f32.partialorder %v2063_v9, 0.0  ;;  %v2191_v35 = vmul.f32 0.2, %v2063_v9  ;;  %2288 = vmatpush.msra.mxu3 %v409_v39 }
 0x159   :  { %v2199_v43 = vsel %vm2183_vm5, %v2063_v9, %v2191_v35  ;;  %2289 = vmatpush.msra.mxu3 %v407_v37  ;;  %v2202_v9 = vperm.slane %v437_v27, 0 }
 0x15a   :  { %2271 = vmatmul.f32.gmra.mxu2 %v2199_v43 }
 0x15b   :  { %2290 = vmatpush.msra.mxu3 %v405_v11 }
 0x15d   :  { %2367 = vmatpush.msrb.mxu3 %v436_v44 }
 0x15f   :  { %2368 = vmatpush.msrb.mxu3 %v434_v31  ;;  %v2203_v31 = vperm.slane %v437_v27, 1 }
 0x161   :  { %2369 = vmatpush.msrb.mxu3 %v432_v47 }
 0x162   :  { %2360 = vmatmul.f32.vlgmr.msrb.gmra.mxu2 %v2195_v24  ;;  %v2074_v42 = vpop.f32.mrf.mxu0 }
 0x163   :  { %2370 = vmatpush.msrb.mxu3 %v430_v38  ;;  %v2088_v1 = vpop.f32.mrf.mxu1  ;;  %v2075_v49 = vadd.f32 %v2074_v42, %v444_v45 }
 0x165   :  { %2371 = vmatpush.msrb.mxu3 %v428_v40  ;;  %v2089_v17 = vadd.f32 %v2088_v1, %v2075_v49 }
 0x167   :  { %2372 = vmatpush.msrb.mxu3 %v426_v28 }
 0x169   :  { %2373 = vmatpush.msrb.mxu3 %v424_v41 }
 0x16a   :  { %2363 = vmatmul.f32.gmra.mxu2 %v2199_v43  ;;  %v2102_v53 = vpop.f32.mrf.mxu2  ;;  %v2076_v55 = vpop.f32.mrf.mxu0  ;;  %v12_v43 = vstv %s5860_s6 }
 0x16b   :  { %2374 = vmatpush.msrb.mxu3 %v422_v50  ;;  %v2116_v58 = vpop.f32.mrf.mxu3  ;;  %v2090_v56 = vpop.f32.mrf.mxu1  ;;  %v2103_v59 = vadd.f32 %v2102_v53, %v2089_v17  ;;  %v2077_v60 = vadd.f32 %v2076_v55, %v444_v45  ;;  %13 = vst [vmem:[#allocation2] sm:$0x1] %v12_v43  ;;  %v438_v53 = vld [vmem:[%s5861_s5] sm:$0x3] }
 0x16d   :  { %2375 = vmatpush.msrb.mxu3 %v420_v36  ;;  %v2117_v62 = vadd.f32 %v2116_v58, %v2103_v59  ;;  %v2091_v52 = vadd.f32 %v2090_v56, %v2077_v60 }
 0x16f   :  { %2376 = vmatpush.msrb.mxu3 %v418_v46 }
 0x171   :  { %2377 = vmatpush.msrb.mxu3 %v416_v51 }
 0x172   :  { %v2104_v32 = vpop.f32.mrf.mxu2 }
 0x173   :  { %2378 = vmatpush.msrb.mxu3 %v414_v34  ;;  %v2118_v63 = vpop.f32.mrf.mxu3  ;;  %v2105_v5 = vadd.f32 %v2104_v32, %v2091_v52 }
 0x175   :  { %2379 = vmatpush.msrb.mxu3 %v412_v10  ;;  %v2119_v12 = vadd.f32 %v2118_v63, %v2105_v5  ;;  %v2403_v10 = vperm.slane %v438_v53, 0 }
 0x177   :  { %2380 = vmatpush.msrb.mxu3 %v410_v54  ;;  %v2404_v54 = vperm.slane %v438_v53, 1 }
 0x179   :  { %2381 = vmatpush.msrb.mxu3 %v408_v61 }
 0x17b   :  { %2382 = vmatpush.msrb.mxu3 %v406_v6 }
 0x182   :  { %v2130_v0 = vpop.f32.mrf.mxu0 }
 0x183   :  { %v2131_v3 = vadd.f32 %v2130_v0, %v2117_v62  ;;  %v2144_v15 = vpop.f32.mrf.mxu1 }
 0x185   :  { %v2145_v7 = vadd.f32 %v2144_v15, %v2131_v3 }
 0x18a   :  { %v2158_v8 = vpop.f32.mrf.mxu2  ;;  %v2132_v16 = vpop.f32.mrf.mxu0 }
 0x18b   :  { %v2159_v48 = vadd.f32 %v2158_v8, %v2145_v7  ;;  %v2172_v14 = vpop.f32.mrf.mxu3  ;;  %v2133_v19 = vadd.f32 %v2132_v16, %v2119_v12  ;;  %v2146_v20 = vpop.f32.mrf.mxu1 }
 0x18d   :  { %v2173_v18 = vadd.f32 %v2172_v14, %v2159_v48  ;;  %v2147_v2 = vadd.f32 %v2146_v20, %v2133_v19  ;;  %v3709_v19 = vld [vmem:[#allocation2] ss:$0 sm:$0xff] }
 0x18f   :  { %vm2180_vm6 = vcmp.gt.f32.partialorder %v2173_v18, 0.0  ;;  %v2188_v30 = vmul.f32 0.2, %v2173_v18 }
 0x191   :  { %v2196_v21 = vsel %vm2180_vm6, %v2173_v18, %v2188_v30 }
 0x192   :  { %v2160_v4 = vpop.f32.mrf.mxu2  ;;  %2291 = vmatmul.f32.vlgmr.msra.gmra.mxu3 %v2196_v21 }
 0x193   :  { %v2161_v22 = vadd.f32 %v2160_v4, %v2147_v2  ;;  %v2174_v23 = vpop.f32.mrf.mxu3 }
 0x195   :  { %v2175_v13 = vadd.f32 %v2174_v23, %v2161_v22 }
 0x197   :  { %vm2184_vm7 = vcmp.gt.f32.partialorder %v2175_v13, 0.0  ;;  %v2192_v57 = vmul.f32 0.2, %v2175_v13 }
 0x199   :  { %v2200_v24 = vsel %vm2184_vm7, %v2175_v13, %v2192_v57 }
 0x19a   :  { %2294 = vmatmul.f32.gmra.mxu3 %v2200_v24 }
 0x1a2   :  { %2383 = vmatmul.f32.vlgmr.msrb.gmra.mxu3 %v2196_v21  ;;  %v2223_v25 = vpop.f32.mrf.mxu0 }
 0x1a3   :  { %v2246_v29 = vpop.f32.mrf.mxu1  ;;  %v2224_v11 = vadd.f32 %v2223_v25, %v2202_v9 }
 0x1a5   :  { %v2247_v47 = vadd.f32 %v2246_v29, %v2224_v11 }
 0x1aa   :  { %2386 = vmatmul.f32.gmra.mxu3 %v2200_v24  ;;  %v2226_v33 = vpop.f32.mrf.mxu0 }
 0x1ab   :  { %v2249_v37 = vpop.f32.mrf.mxu1  ;;  %v2227_v50 = vadd.f32 %v2226_v33, %v2202_v9 }
 0x1ad   :  { %v2250_v46 = vadd.f32 %v2249_v37, %v2227_v50 }
 0x1c2   :  { %v2315_v44 = vpop.f32.mrf.mxu0 }
 0x1c3   :  { %v2316_v40 = vadd.f32 %v2315_v44, %v2203_v31  ;;  %v2338_v41 = vpop.f32.mrf.mxu1 }
 0x1c5   :  { %v2339_v1 = vadd.f32 %v2338_v41, %v2316_v40 }
 0x1ca   :  { %v2318_v36 = vpop.f32.mrf.mxu0 }
 0x1cb   :  { %v2319_v34 = vadd.f32 %v2318_v36, %v2203_v31  ;;  %v2341_v61 = vpop.f32.mrf.mxu1 }
 0x1cd   :  { %v2342_v62 = vadd.f32 %v2341_v61, %v2319_v34 }
 0x1d5   :  { %v2269_v26 = vpop.f32.mrf.mxu2 }
 0x1d6   :  { %v2270_v28 = vadd.f32 %v2269_v26, %v2247_v47 }
 0x1dd   :  { %v2272_v39 = vpop.f32.mrf.mxu2 }
 0x1de   :  { %v2273_v17 = vadd.f32 %v2272_v39, %v2250_v46 }
 0x1e5   :  { %v2361_v42 = vpop.f32.mrf.mxu2 }
 0x1e6   :  { %v2362_v49 = vadd.f32 %v2361_v42, %v2339_v1 }
 0x1ed   :  { %v2364_v32 = vpop.f32.mrf.mxu2 }
 0x1ee   :  { %v2365_v6 = vadd.f32 %v2364_v32, %v2342_v62 }
 0x215   :  { %v2292_v35 = vpop.f32.mrf.mxu3 }
 0x216   :  { %v2293_v45 = vadd.f32 %v2292_v35, %v2270_v28 }
 0x218   :  { %v2394_v51 = vmul.f32 0.2, %v2293_v45  ;;  %vm2390_vm8 = vcmp.gt.f32.partialorder %v2293_v45, 0.0 }
 0x21a   :  { %v2398_v60 = vsel %vm2390_vm8, %v2293_v45, %v2394_v51 }
 0x21b   :  { %v2407_v63 = vmul.f32 %v2403_v10, %v2398_v60 }
 0x21d   :  { %v2295_v38 = vpop.f32.mrf.mxu3 }
 0x21e   :  { %v2296_v56 = vadd.f32 %v2295_v38, %v2273_v17 }
 0x220   :  { %v2396_v3 = vmul.f32 0.2, %v2296_v56  ;;  %vm2392_vm10 = vcmp.gt.f32.partialorder %v2296_v56, 0.0 }
 0x222   :  { %v2400_v12 = vsel %vm2392_vm10, %v2296_v56, %v2396_v3 }
 0x223   :  { %v2409_v14 = vmul.f32 %v2403_v10, %v2400_v12 }
 0x225   :  { %v2384_v58 = vpop.f32.mrf.mxu3 }
 0x226   :  { %v2385_v55 = vadd.f32 %v2384_v58, %v2362_v49 }
 0x228   :  { %vm2391_vm9 = vcmp.gt.f32.partialorder %v2385_v55, 0.0  ;;  %v2395_v59 = vmul.f32 0.2, %v2385_v55 }
 0x22a   :  { %v2399_v52 = vsel %vm2391_vm9, %v2385_v55, %v2395_v59 }
 0x22b   :  { %v2408_v0 = vmul.f32 %v2404_v54, %v2399_v52 }
 0x22d   :  { %v2387_v15 = vpop.f32.mrf.mxu3  ;;  %v2411_v5 = vadd.f32 %v2408_v0, %v2407_v63 }
 0x22e   :  { %v2388_v7 = vadd.f32 %v2387_v15, %v2365_v6 }
 0x22f   :  { %2412 = vadd.xlane.f32.xlu0 %v2411_v5 }
 0x230   :  { %vm2393_vm11 = vcmp.gt.f32.partialorder %v2388_v7, 0.0  ;;  %v2397_v8 = vmul.f32 0.2, %v2388_v7 }
 0x232   :  { %v2401_v48 = vsel %vm2393_vm11, %v2388_v7, %v2397_v8 }
 0x233   :  { %v2410_v16 = vmul.f32 %v2404_v54, %v2401_v48 }
 0x235   :  { %v2414_v18 = vadd.f32 %v2410_v16, %v2409_v14 }
 0x237   :  { %2415 = vadd.xlane.f32.xlu0 %v2414_v18 }
 0x2a2   :  { %v2413_v30 = vpop.xlane.xlu0 %2412 }
 0x2a3   :  { %v2420_v20 = vadd.f32 %v3709_v19, %v2413_v30 }
 0x2a5   :  { %2423 = vst.msk [vmem:[%s5862_s7] sm:$0xff] %vm2422_vm12, %v2420_v20 }
 0x2aa   :  { %v2416_v2 = vpop.xlane.xlu0 %2415 }
 0x2ab   :  { %v2421_v21 = vadd.f32 %v3709_v19, %v2416_v2 }
 0x2ad   :  { %2424 = vst.msk [vmem:[%s5862_s7 + $0x8] sm:$0xff] %vm2422_vm12, %v2421_v21 }

</bundles_post_ra>
